<compile_context>
chip_gen: v5e
topology: v5e:2x2
jax: 0.10.0
libtpu: 0.0.40
codegen_flags: <defaults>
</compile_context>

<pallas_src>
import functools

import jax
import jax.numpy as jnp
from jax.experimental import pallas as pl
from jax.experimental.pallas import tpu as pltpu


def _make_lstm_kernel(num_layers: int, seq_len: int, batch: int,
                      hidden_size: int):
    """Builds a Pallas kernel closed over static num_layers / T / B / H."""

    H = hidden_size
    B = batch
    T = seq_len

    def kernel(*args):
        # args: x2d_ref, [w_ih_t, w_hh_t, bias] * num_layers, fc_w_t, fc_b,
        #       out_ref, seq_scratch (T*B, H), gin_scratch (T*B, 4H)
        x_ref = args[0]
        layer_refs = args[1:1 + 3 * num_layers]
        fcw_ref = args[1 + 3 * num_layers]
        fcb_ref = args[2 + 3 * num_layers]
        out_ref = args[3 + 3 * num_layers]
        seq_ref, gin_ref = args[4 + 3 * num_layers:]

        h = jnp.zeros((B, H), jnp.float32)

        for l in range(num_layers):           # static unroll over layers
            w_ih = layer_refs[3 * l][...]      # (in_dim, 4H)
            w_hh = layer_refs[3 * l + 1][...]  # (H, 4H)
            bias = layer_refs[3 * l + 2][...]  # (1, 4H)  (= b_ih + b_hh)

            # ---- hoisted input projection: ONE MXU matmul per layer ----
            # Off the serial critical path; bias folded in here (no per-step
            # broadcast inside the recurrence).
            inp = x_ref[...] if l == 0 else seq_ref[...]   # (T*B, in_dim)
            gin_ref[...] = (
                jnp.dot(inp, w_ih, preferred_element_type=jnp.float32) + bias
            )                                               # (T*B, 4H)

            # ---- recurrence: h, c live in vregs, loop fully unrolled ----
            h = jnp.zeros((B, H), jnp.float32)
            c = jnp.zeros((B, H), jnp.float32)
            is_last = (l == num_layers - 1)

            for t in range(T):                 # static T -> static indices
                gates = (
                    gin_ref[t * B:(t + 1) * B, :]
                    + jnp.dot(h, w_hh, preferred_element_type=jnp.float32)
                )                                           # (B, 4H)
                i = jax.nn.sigmoid(gates[:, 0 * H:1 * H])
                f = jax.nn.sigmoid(gates[:, 1 * H:2 * H])
                g = jnp.tanh(gates[:, 2 * H:3 * H])
                o = jax.nn.sigmoid(gates[:, 3 * H:4 * H])
                c = f * c + i * g
                h = o * jnp.tanh(c)
                if not is_last:
                    # only layers that feed a next layer store their sequence
                    seq_ref[t * B:(t + 1) * B, :] = h

        # fc on the last time step's hidden state of the last layer
        out_ref[...] = (
            jnp.dot(h, fcw_ref[...], preferred_element_type=jnp.float32)
            + fcb_ref[...]
        )

    return kernel


def lstm_forward_pallas(x, lstm_params, fc_w, fc_b,
                        *, num_layers, hidden_size):
    """x: (B, T, I) float32 (PyTorch batch_first layout).

    lstm_params: list of (w_ih (4H, in_dim), w_hh (4H, H), b_ih (4H,), b_hh (4H,))
    fc_w: (C, H), fc_b: (C,)
    Returns (B, C).
    """
    B, T, I = x.shape
    H = hidden_size
    C = fc_w.shape[0]

    # ---- glue: layout prep (plain JAX) ----
    # time-major, rows flattened so row t*B + b == (time t, batch b)
    x_tm = jnp.transpose(x, (1, 0, 2)).reshape(T * B, I).astype(jnp.float32)

    flat_args = [x_tm]
    for (w_ih, w_hh, b_ih, b_hh) in lstm_params:
        flat_args.append(jnp.transpose(w_ih).astype(jnp.float32))      # (in, 4H)
        flat_args.append(jnp.transpose(w_hh).astype(jnp.float32))      # (H, 4H)
        flat_args.append((b_ih + b_hh).reshape(1, 4 * H).astype(jnp.float32))
    flat_args.append(jnp.transpose(fc_w).astype(jnp.float32))          # (H, C)
    flat_args.append(fc_b.reshape(1, C).astype(jnp.float32))

    kernel = _make_lstm_kernel(num_layers, T, B, H)

    vmem_spec = pl.BlockSpec(memory_space=pltpu.MemorySpace.VMEM)
    out = pl.pallas_call(
        kernel,
        out_shape=jax.ShapeDtypeStruct((B, C), jnp.float32),
        in_specs=[vmem_spec] * len(flat_args),
        out_specs=vmem_spec,
        scratch_shapes=[
            pltpu.VMEM((T * B, H), jnp.float32),      # inter-layer sequence
            pltpu.VMEM((T * B, 4 * H), jnp.float32),  # hoisted input gates
        ],
    )(*flat_args)
    return out


# ---------------- pure-JAX reference for validation ----------------
def lstm_forward_ref(x, lstm_params, fc_w, fc_b):
    B, T, _ = x.shape
    inp = x
    for (w_ih, w_hh, b_ih, b_hh) in lstm_params:
        H = w_hh.shape[1]
        h = jnp.zeros((B, H), jnp.float32)
        c = jnp.zeros((B, H), jnp.float32)
        outs = []
        for t in range(T):
            gates = inp[:, t] @ w_ih.T + h @ w_hh.T + b_ih + b_hh
            i, f, g, o = jnp.split(gates, 4, axis=1)
            i, f, o = jax.nn.sigmoid(i), jax.nn.sigmoid(f), jax.nn.sigmoid(o)
            g = jnp.tanh(g)
            c = f * c + i * g
            h = o * jnp.tanh(c)
            outs.append(h)
        inp = jnp.stack(outs, axis=1)
    return inp[:, -1] @ fc_w.T + fc_b


if __name__ == "__main__":
    # Small shapes consistent with the module's forward.
    batch = 2
    seq_len = 8
    input_size = 16
    hidden_size = 32
    num_layers = 2
    num_classes = 5

    key = jax.random.PRNGKey(0)
    k_in, key = jax.random.split(key)
    x = jax.random.normal(k_in, (batch, seq_len, input_size), jnp.float32)

    # Deterministic parameter init (PyTorch-style U(-1/sqrt(H), 1/sqrt(H))).
    bound = 1.0 / (hidden_size ** 0.5)
    lstm_params = []
    for layer in range(num_layers):
        in_dim = input_size if layer == 0 else hidden_size
        k1, k2, k3, k4, key = jax.random.split(key, 5)
        w_ih = jax.random.uniform(k1, (4 * hidden_size, in_dim),
                                  jnp.float32, -bound, bound)
        w_hh = jax.random.uniform(k2, (4 * hidden_size, hidden_size),
                                  jnp.float32, -bound, bound)
        b_ih = jax.random.uniform(k3, (4 * hidden_size,),
                                  jnp.float32, -bound, bound)
        b_hh = jax.random.uniform(k4, (4 * hidden_size,),
                                  jnp.float32, -bound, bound)
        lstm_params.append((w_ih, w_hh, b_ih, b_hh))

    k5, k6, key = jax.random.split(key, 3)
    fc_bound = 1.0 / (hidden_size ** 0.5)
    fc_w = jax.random.uniform(k5, (num_classes, hidden_size),
                              jnp.float32, -fc_bound, fc_bound)
    fc_b = jax.random.uniform(k6, (num_classes,),
                              jnp.float32, -fc_bound, fc_bound)

    run = functools.partial(lstm_forward_pallas,
                            num_layers=num_layers, hidden_size=hidden_size)
    out = run(x, lstm_params, fc_w, fc_b)
    out = jax.block_until_ready(out)

    ref = lstm_forward_ref(x, lstm_params, fc_w, fc_b)
    assert out.shape == (batch, num_classes)
    assert jnp.allclose(out, ref, atol=1e-5, rtol=1e-5), (
        f"max abs err = {jnp.max(jnp.abs(out - ref))}")

    print("KERNEL_OK")
</pallas_src>

<mosaic_0001>
module attributes {stable_mosaic.version = 11 : i64} {
  func.func @kernel(%arg0: memref<16x16xf32, #tpu.memory_space<vmem>>, %arg1: memref<16x128xf32, #tpu.memory_space<vmem>>, %arg2: memref<32x128xf32, #tpu.memory_space<vmem>>, %arg3: memref<1x128xf32, #tpu.memory_space<vmem>>, %arg4: memref<32x128xf32, #tpu.memory_space<vmem>>, %arg5: memref<32x128xf32, #tpu.memory_space<vmem>>, %arg6: memref<1x128xf32, #tpu.memory_space<vmem>>, %arg7: memref<32x5xf32, #tpu.memory_space<vmem>>, %arg8: memref<1x5xf32, #tpu.memory_space<vmem>>, %arg9: memref<2x5xf32, #tpu.memory_space<vmem>>, %arg10: memref<16x32xf32, #tpu.memory_space<vmem>>, %arg11: memref<16x128xf32, #tpu.memory_space<vmem>>) attributes {dimension_semantics = [], scalar_prefetch = 0 : i64, scratch_operands = 2 : i64, tpu.core_type = #tpu.core_type<tc>} {
    %c0 = arith.constant 0 : index
    %c0_0 = arith.constant 0 : index
    %0 = vector.load %arg1[%c0, %c0_0] : memref<16x128xf32, #tpu.memory_space<vmem>>, vector<16x128xf32>
    %c0_1 = arith.constant 0 : index
    %c0_2 = arith.constant 0 : index
    %1 = vector.load %arg2[%c0_1, %c0_2] : memref<32x128xf32, #tpu.memory_space<vmem>>, vector<32x128xf32>
    %c0_3 = arith.constant 0 : index
    %c0_4 = arith.constant 0 : index
    %2 = vector.load %arg3[%c0_3, %c0_4] : memref<1x128xf32, #tpu.memory_space<vmem>>, vector<1x128xf32>
    %c0_5 = arith.constant 0 : index
    %c0_6 = arith.constant 0 : index
    %3 = vector.load %arg0[%c0_5, %c0_6] : memref<16x16xf32, #tpu.memory_space<vmem>>, vector<16x16xf32>
    %cst = arith.constant dense<0.000000e+00> : vector<16x128xf32>
    %4 = tpu.matmul %3, %0, %cst {dimension_numbers = #tpu.dot_dimension_numbers<[1], [0], [0], [1], [0, 0, 1, 1], [], []>} : vector<16x16xf32>, vector<16x128xf32>, vector<16x128xf32> -> vector<16x128xf32>
    %5 = vector.broadcast %2 : vector<1x128xf32> to vector<16x128xf32>
    %6 = arith.addf %4, %5 : vector<16x128xf32>
    %c0_7 = arith.constant 0 : index
    %c0_8 = arith.constant 0 : index
    %7 = vector.load %arg11[%c0_7, %c0_8] : memref<16x128xf32, #tpu.memory_space<vmem>>, vector<16x128xf32>
    tpu.vector_store %arg11[%c0_7, %c0_8], %6 {strides = array<i32>} : memref<16x128xf32, #tpu.memory_space<vmem>>, vector<16x128xf32>,
    %cst_9 = arith.constant 0.000000e+00 : f32
    %8 = vector.broadcast %cst_9 : f32 to vector<2x32xf32>
    %cst_10 = arith.constant 0.000000e+00 : f32
    %9 = vector.broadcast %cst_10 : f32 to vector<2x32xf32>
    %c0_11 = arith.constant 0 : index
    %c0_12 = arith.constant 0 : index
    %10 = vector.load %arg11[%c0_11, %c0_12] : memref<16x128xf32, #tpu.memory_space<vmem>>, vector<2x128xf32>
    %cst_13 = arith.constant dense<0.000000e+00> : vector<2x128xf32>
    %11 = tpu.matmul %8, %1, %cst_13 {dimension_numbers = #tpu.dot_dimension_numbers<[1], [0], [0], [1], [0, 0, 1, 1], [], []>} : vector<2x32xf32>, vector<32x128xf32>, vector<2x128xf32> -> vector<2x128xf32>
    %12 = arith.addf %10, %11 : vector<2x128xf32>
    %13 = vector.extract_strided_slice %12 {offsets = [0, 0], sizes = [2, 32], strides = [1, 1]} : vector<2x128xf32> to vector<2x32xf32>
    %14 = arith.negf %13 : vector<2x32xf32>
    %15 = math.exp %14 : vector<2x32xf32>
    %cst_14 = arith.constant 1.000000e+00 : f32
    %16 = vector.broadcast %cst_14 : f32 to vector<2x32xf32>
    %17 = arith.addf %16, %15 : vector<2x32xf32>
    %18 = arith.divf %16, %17 : vector<2x32xf32>
    %19 = vector.extract_strided_slice %12 {offsets = [0, 32], sizes = [2, 32], strides = [1, 1]} : vector<2x128xf32> to vector<2x32xf32>
    %20 = arith.negf %19 : vector<2x32xf32>
    %21 = math.exp %20 : vector<2x32xf32>
    %cst_15 = arith.constant 1.000000e+00 : f32
    %22 = vector.broadcast %cst_15 : f32 to vector<2x32xf32>
    %23 = arith.addf %22, %21 : vector<2x32xf32>
    %24 = arith.divf %22, %23 : vector<2x32xf32>
    %25 = vector.extract_strided_slice %12 {offsets = [0, 64], sizes = [2, 32], strides = [1, 1]} : vector<2x128xf32> to vector<2x32xf32>
    %26 = math.tanh %25 : vector<2x32xf32>
    %27 = vector.extract_strided_slice %12 {offsets = [0, 96], sizes = [2, 32], strides = [1, 1]} : vector<2x128xf32> to vector<2x32xf32>
    %28 = arith.negf %27 : vector<2x32xf32>
    %29 = math.exp %28 : vector<2x32xf32>
    %cst_16 = arith.constant 1.000000e+00 : f32
    %30 = vector.broadcast %cst_16 : f32 to vector<2x32xf32>
    %31 = arith.addf %30, %29 : vector<2x32xf32>
    %32 = arith.divf %30, %31 : vector<2x32xf32>
    %33 = arith.mulf %24, %9 : vector<2x32xf32>
    %34 = arith.mulf %18, %26 : vector<2x32xf32>
    %35 = arith.addf %33, %34 : vector<2x32xf32>
    %36 = math.tanh %35 : vector<2x32xf32>
    %37 = arith.mulf %32, %36 : vector<2x32xf32>
    %c0_17 = arith.constant 0 : index
    %c0_18 = arith.constant 0 : index
    %38 = vector.load %arg10[%c0_17, %c0_18] : memref<16x32xf32, #tpu.memory_space<vmem>>, vector<2x32xf32>
    tpu.vector_store %arg10[%c0_17, %c0_18], %37 {strides = array<i32>} : memref<16x32xf32, #tpu.memory_space<vmem>>, vector<2x32xf32>,
    %c2 = arith.constant 2 : index
    %c0_19 = arith.constant 0 : index
    %39 = vector.load %arg11[%c2, %c0_19] : memref<16x128xf32, #tpu.memory_space<vmem>>, vector<2x128xf32>
    %cst_20 = arith.constant dense<0.000000e+00> : vector<2x128xf32>
    %40 = tpu.matmul %37, %1, %cst_20 {dimension_numbers = #tpu.dot_dimension_numbers<[1], [0], [0], [1], [0, 0, 1, 1], [], []>} : vector<2x32xf32>, vector<32x128xf32>, vector<2x128xf32> -> vector<2x128xf32>
    %41 = arith.addf %39, %40 : vector<2x128xf32>
    %42 = vector.extract_strided_slice %41 {offsets = [0, 0], sizes = [2, 32], strides = [1, 1]} : vector<2x128xf32> to vector<2x32xf32>
    %43 = arith.negf %42 : vector<2x32xf32>
    %44 = math.exp %43 : vector<2x32xf32>
    %cst_21 = arith.constant 1.000000e+00 : f32
    %45 = vector.broadcast %cst_21 : f32 to vector<2x32xf32>
    %46 = arith.addf %45, %44 : vector<2x32xf32>
    %47 = arith.divf %45, %46 : vector<2x32xf32>
    %48 = vector.extract_strided_slice %41 {offsets = [0, 32], sizes = [2, 32], strides = [1, 1]} : vector<2x128xf32> to vector<2x32xf32>
    %49 = arith.negf %48 : vector<2x32xf32>
    %50 = math.exp %49 : vector<2x32xf32>
    %cst_22 = arith.constant 1.000000e+00 : f32
    %51 = vector.broadcast %cst_22 : f32 to vector<2x32xf32>
    %52 = arith.addf %51, %50 : vector<2x32xf32>
    %53 = arith.divf %51, %52 : vector<2x32xf32>
    %54 = vector.extract_strided_slice %41 {offsets = [0, 64], sizes = [2, 32], strides = [1, 1]} : vector<2x128xf32> to vector<2x32xf32>
    %55 = math.tanh %54 : vector<2x32xf32>
    %56 = vector.extract_strided_slice %41 {offsets = [0, 96], sizes = [2, 32], strides = [1, 1]} : vector<2x128xf32> to vector<2x32xf32>
    %57 = arith.negf %56 : vector<2x32xf32>
    %58 = math.exp %57 : vector<2x32xf32>
    %cst_23 = arith.constant 1.000000e+00 : f32
    %59 = vector.broadcast %cst_23 : f32 to vector<2x32xf32>
    %60 = arith.addf %59, %58 : vector<2x32xf32>
    %61 = arith.divf %59, %60 : vector<2x32xf32>
    %62 = arith.mulf %53, %35 : vector<2x32xf32>
    %63 = arith.mulf %47, %55 : vector<2x32xf32>
    %64 = arith.addf %62, %63 : vector<2x32xf32>
    %65 = math.tanh %64 : vector<2x32xf32>
    %66 = arith.mulf %61, %65 : vector<2x32xf32>
    %c2_24 = arith.constant 2 : index
    %c0_25 = arith.constant 0 : index
    %67 = vector.load %arg10[%c2_24, %c0_25] : memref<16x32xf32, #tpu.memory_space<vmem>>, vector<2x32xf32>
    tpu.vector_store %arg10[%c2_24, %c0_25], %66 {strides = array<i32>} : memref<16x32xf32, #tpu.memory_space<vmem>>, vector<2x32xf32>,
    %c4 = arith.constant 4 : index
    %c0_26 = arith.constant 0 : index
    %68 = vector.load %arg11[%c4, %c0_26] : memref<16x128xf32, #tpu.memory_space<vmem>>, vector<2x128xf32>
    %cst_27 = arith.constant dense<0.000000e+00> : vector<2x128xf32>
    %69 = tpu.matmul %66, %1, %cst_27 {dimension_numbers = #tpu.dot_dimension_numbers<[1], [0], [0], [1], [0, 0, 1, 1], [], []>} : vector<2x32xf32>, vector<32x128xf32>, vector<2x128xf32> -> vector<2x128xf32>
    %70 = arith.addf %68, %69 : vector<2x128xf32>
    %71 = vector.extract_strided_slice %70 {offsets = [0, 0], sizes = [2, 32], strides = [1, 1]} : vector<2x128xf32> to vector<2x32xf32>
    %72 = arith.negf %71 : vector<2x32xf32>
    %73 = math.exp %72 : vector<2x32xf32>
    %cst_28 = arith.constant 1.000000e+00 : f32
    %74 = vector.broadcast %cst_28 : f32 to vector<2x32xf32>
    %75 = arith.addf %74, %73 : vector<2x32xf32>
    %76 = arith.divf %74, %75 : vector<2x32xf32>
    %77 = vector.extract_strided_slice %70 {offsets = [0, 32], sizes = [2, 32], strides = [1, 1]} : vector<2x128xf32> to vector<2x32xf32>
    %78 = arith.negf %77 : vector<2x32xf32>
    %79 = math.exp %78 : vector<2x32xf32>
    %cst_29 = arith.constant 1.000000e+00 : f32
    %80 = vector.broadcast %cst_29 : f32 to vector<2x32xf32>
    %81 = arith.addf %80, %79 : vector<2x32xf32>
    %82 = arith.divf %80, %81 : vector<2x32xf32>
    %83 = vector.extract_strided_slice %70 {offsets = [0, 64], sizes = [2, 32], strides = [1, 1]} : vector<2x128xf32> to vector<2x32xf32>
    %84 = math.tanh %83 : vector<2x32xf32>
    %85 = vector.extract_strided_slice %70 {offsets = [0, 96], sizes = [2, 32], strides = [1, 1]} : vector<2x128xf32> to vector<2x32xf32>
    %86 = arith.negf %85 : vector<2x32xf32>
    %87 = math.exp %86 : vector<2x32xf32>
    %cst_30 = arith.constant 1.000000e+00 : f32
    %88 = vector.broadcast %cst_30 : f32 to vector<2x32xf32>
    %89 = arith.addf %88, %87 : vector<2x32xf32>
    %90 = arith.divf %88, %89 : vector<2x32xf32>
    %91 = arith.mulf %82, %64 : vector<2x32xf32>
    %92 = arith.mulf %76, %84 : vector<2x32xf32>
    %93 = arith.addf %91, %92 : vector<2x32xf32>
    %94 = math.tanh %93 : vector<2x32xf32>
    %95 = arith.mulf %90, %94 : vector<2x32xf32>
    %c4_31 = arith.constant 4 : index
    %c0_32 = arith.constant 0 : index
    %96 = vector.load %arg10[%c4_31, %c0_32] : memref<16x32xf32, #tpu.memory_space<vmem>>, vector<2x32xf32>
    tpu.vector_store %arg10[%c4_31, %c0_32], %95 {strides = array<i32>} : memref<16x32xf32, #tpu.memory_space<vmem>>, vector<2x32xf32>,
    %c6 = arith.constant 6 : index
    %c0_33 = arith.constant 0 : index
    %97 = vector.load %arg11[%c6, %c0_33] : memref<16x128xf32, #tpu.memory_space<vmem>>, vector<2x128xf32>
    %cst_34 = arith.constant dense<0.000000e+00> : vector<2x128xf32>
    %98 = tpu.matmul %95, %1, %cst_34 {dimension_numbers = #tpu.dot_dimension_numbers<[1], [0], [0], [1], [0, 0, 1, 1], [], []>} : vector<2x32xf32>, vector<32x128xf32>, vector<2x128xf32> -> vector<2x128xf32>
    %99 = arith.addf %97, %98 : vector<2x128xf32>
    %100 = vector.extract_strided_slice %99 {offsets = [0, 0], sizes = [2, 32], strides = [1, 1]} : vector<2x128xf32> to vector<2x32xf32>
    %101 = arith.negf %100 : vector<2x32xf32>
    %102 = math.exp %101 : vector<2x32xf32>
    %cst_35 = arith.constant 1.000000e+00 : f32
    %103 = vector.broadcast %cst_35 : f32 to vector<2x32xf32>
    %104 = arith.addf %103, %102 : vector<2x32xf32>
    %105 = arith.divf %103, %104 : vector<2x32xf32>
    %106 = vector.extract_strided_slice %99 {offsets = [0, 32], sizes = [2, 32], strides = [1, 1]} : vector<2x128xf32> to vector<2x32xf32>
    %107 = arith.negf %106 : vector<2x32xf32>
    %108 = math.exp %107 : vector<2x32xf32>
    %cst_36 = arith.constant 1.000000e+00 : f32
    %109 = vector.broadcast %cst_36 : f32 to vector<2x32xf32>
    %110 = arith.addf %109, %108 : vector<2x32xf32>
    %111 = arith.divf %109, %110 : vector<2x32xf32>
    %112 = vector.extract_strided_slice %99 {offsets = [0, 64], sizes = [2, 32], strides = [1, 1]} : vector<2x128xf32> to vector<2x32xf32>
    %113 = math.tanh %112 : vector<2x32xf32>
    %114 = vector.extract_strided_slice %99 {offsets = [0, 96], sizes = [2, 32], strides = [1, 1]} : vector<2x128xf32> to vector<2x32xf32>
    %115 = arith.negf %114 : vector<2x32xf32>
    %116 = math.exp %115 : vector<2x32xf32>
    %cst_37 = arith.constant 1.000000e+00 : f32
    %117 = vector.broadcast %cst_37 : f32 to vector<2x32xf32>
    %118 = arith.addf %117, %116 : vector<2x32xf32>
    %119 = arith.divf %117, %118 : vector<2x32xf32>
    %120 = arith.mulf %111, %93 : vector<2x32xf32>
    %121 = arith.mulf %105, %113 : vector<2x32xf32>
    %122 = arith.addf %120, %121 : vector<2x32xf32>
    %123 = math.tanh %122 : vector<2x32xf32>
    %124 = arith.mulf %119, %123 : vector<2x32xf32>
    %c6_38 = arith.constant 6 : index
    %c0_39 = arith.constant 0 : index
    %125 = vector.load %arg10[%c6_38, %c0_39] : memref<16x32xf32, #tpu.memory_space<vmem>>, vector<2x32xf32>
    tpu.vector_store %arg10[%c6_38, %c0_39], %124 {strides = array<i32>} : memref<16x32xf32, #tpu.memory_space<vmem>>, vector<2x32xf32>,
    %c8 = arith.constant 8 : index
    %c0_40 = arith.constant 0 : index
    %126 = vector.load %arg11[%c8, %c0_40] : memref<16x128xf32, #tpu.memory_space<vmem>>, vector<2x128xf32>
    %cst_41 = arith.constant dense<0.000000e+00> : vector<2x128xf32>
    %127 = tpu.matmul %124, %1, %cst_41 {dimension_numbers = #tpu.dot_dimension_numbers<[1], [0], [0], [1], [0, 0, 1, 1], [], []>} : vector<2x32xf32>, vector<32x128xf32>, vector<2x128xf32> -> vector<2x128xf32>
    %128 = arith.addf %126, %127 : vector<2x128xf32>
    %129 = vector.extract_strided_slice %128 {offsets = [0, 0], sizes = [2, 32], strides = [1, 1]} : vector<2x128xf32> to vector<2x32xf32>
    %130 = arith.negf %129 : vector<2x32xf32>
    %131 = math.exp %130 : vector<2x32xf32>
    %cst_42 = arith.constant 1.000000e+00 : f32
    %132 = vector.broadcast %cst_42 : f32 to vector<2x32xf32>
    %133 = arith.addf %132, %131 : vector<2x32xf32>
    %134 = arith.divf %132, %133 : vector<2x32xf32>
    %135 = vector.extract_strided_slice %128 {offsets = [0, 32], sizes = [2, 32], strides = [1, 1]} : vector<2x128xf32> to vector<2x32xf32>
    %136 = arith.negf %135 : vector<2x32xf32>
    %137 = math.exp %136 : vector<2x32xf32>
    %cst_43 = arith.constant 1.000000e+00 : f32
    %138 = vector.broadcast %cst_43 : f32 to vector<2x32xf32>
    %139 = arith.addf %138, %137 : vector<2x32xf32>
    %140 = arith.divf %138, %139 : vector<2x32xf32>
    %141 = vector.extract_strided_slice %128 {offsets = [0, 64], sizes = [2, 32], strides = [1, 1]} : vector<2x128xf32> to vector<2x32xf32>
    %142 = math.tanh %141 : vector<2x32xf32>
    %143 = vector.extract_strided_slice %128 {offsets = [0, 96], sizes = [2, 32], strides = [1, 1]} : vector<2x128xf32> to vector<2x32xf32>
    %144 = arith.negf %143 : vector<2x32xf32>
    %145 = math.exp %144 : vector<2x32xf32>
    %cst_44 = arith.constant 1.000000e+00 : f32
    %146 = vector.broadcast %cst_44 : f32 to vector<2x32xf32>
    %147 = arith.addf %146, %145 : vector<2x32xf32>
    %148 = arith.divf %146, %147 : vector<2x32xf32>
    %149 = arith.mulf %140, %122 : vector<2x32xf32>
    %150 = arith.mulf %134, %142 : vector<2x32xf32>
    %151 = arith.addf %149, %150 : vector<2x32xf32>
    %152 = math.tanh %151 : vector<2x32xf32>
    %153 = arith.mulf %148, %152 : vector<2x32xf32>
    %c8_45 = arith.constant 8 : index
    %c0_46 = arith.constant 0 : index
    %154 = vector.load %arg10[%c8_45, %c0_46] : memref<16x32xf32, #tpu.memory_space<vmem>>, vector<2x32xf32>
    tpu.vector_store %arg10[%c8_45, %c0_46], %153 {strides = array<i32>} : memref<16x32xf32, #tpu.memory_space<vmem>>, vector<2x32xf32>,
    %c10 = arith.constant 10 : index
    %c0_47 = arith.constant 0 : index
    %155 = vector.load %arg11[%c10, %c0_47] : memref<16x128xf32, #tpu.memory_space<vmem>>, vector<2x128xf32>
    %cst_48 = arith.constant dense<0.000000e+00> : vector<2x128xf32>
    %156 = tpu.matmul %153, %1, %cst_48 {dimension_numbers = #tpu.dot_dimension_numbers<[1], [0], [0], [1], [0, 0, 1, 1], [], []>} : vector<2x32xf32>, vector<32x128xf32>, vector<2x128xf32> -> vector<2x128xf32>
    %157 = arith.addf %155, %156 : vector<2x128xf32>
    %158 = vector.extract_strided_slice %157 {offsets = [0, 0], sizes = [2, 32], strides = [1, 1]} : vector<2x128xf32> to vector<2x32xf32>
    %159 = arith.negf %158 : vector<2x32xf32>
    %160 = math.exp %159 : vector<2x32xf32>
    %cst_49 = arith.constant 1.000000e+00 : f32
    %161 = vector.broadcast %cst_49 : f32 to vector<2x32xf32>
    %162 = arith.addf %161, %160 : vector<2x32xf32>
    %163 = arith.divf %161, %162 : vector<2x32xf32>
    %164 = vector.extract_strided_slice %157 {offsets = [0, 32], sizes = [2, 32], strides = [1, 1]} : vector<2x128xf32> to vector<2x32xf32>
    %165 = arith.negf %164 : vector<2x32xf32>
    %166 = math.exp %165 : vector<2x32xf32>
    %cst_50 = arith.constant 1.000000e+00 : f32
    %167 = vector.broadcast %cst_50 : f32 to vector<2x32xf32>
    %168 = arith.addf %167, %166 : vector<2x32xf32>
    %169 = arith.divf %167, %168 : vector<2x32xf32>
    %170 = vector.extract_strided_slice %157 {offsets = [0, 64], sizes = [2, 32], strides = [1, 1]} : vector<2x128xf32> to vector<2x32xf32>
    %171 = math.tanh %170 : vector<2x32xf32>
    %172 = vector.extract_strided_slice %157 {offsets = [0, 96], sizes = [2, 32], strides = [1, 1]} : vector<2x128xf32> to vector<2x32xf32>
    %173 = arith.negf %172 : vector<2x32xf32>
    %174 = math.exp %173 : vector<2x32xf32>
    %cst_51 = arith.constant 1.000000e+00 : f32
    %175 = vector.broadcast %cst_51 : f32 to vector<2x32xf32>
    %176 = arith.addf %175, %174 : vector<2x32xf32>
    %177 = arith.divf %175, %176 : vector<2x32xf32>
    %178 = arith.mulf %169, %151 : vector<2x32xf32>
    %179 = arith.mulf %163, %171 : vector<2x32xf32>
    %180 = arith.addf %178, %179 : vector<2x32xf32>
    %181 = math.tanh %180 : vector<2x32xf32>
    %182 = arith.mulf %177, %181 : vector<2x32xf32>
    %c10_52 = arith.constant 10 : index
    %c0_53 = arith.constant 0 : index
    %183 = vector.load %arg10[%c10_52, %c0_53] : memref<16x32xf32, #tpu.memory_space<vmem>>, vector<2x32xf32>
    tpu.vector_store %arg10[%c10_52, %c0_53], %182 {strides = array<i32>} : memref<16x32xf32, #tpu.memory_space<vmem>>, vector<2x32xf32>,
    %c12 = arith.constant 12 : index
    %c0_54 = arith.constant 0 : index
    %184 = vector.load %arg11[%c12, %c0_54] : memref<16x128xf32, #tpu.memory_space<vmem>>, vector<2x128xf32>
    %cst_55 = arith.constant dense<0.000000e+00> : vector<2x128xf32>
    %185 = tpu.matmul %182, %1, %cst_55 {dimension_numbers = #tpu.dot_dimension_numbers<[1], [0], [0], [1], [0, 0, 1, 1], [], []>} : vector<2x32xf32>, vector<32x128xf32>, vector<2x128xf32> -> vector<2x128xf32>
    %186 = arith.addf %184, %185 : vector<2x128xf32>
    %187 = vector.extract_strided_slice %186 {offsets = [0, 0], sizes = [2, 32], strides = [1, 1]} : vector<2x128xf32> to vector<2x32xf32>
    %188 = arith.negf %187 : vector<2x32xf32>
    %189 = math.exp %188 : vector<2x32xf32>
    %cst_56 = arith.constant 1.000000e+00 : f32
    %190 = vector.broadcast %cst_56 : f32 to vector<2x32xf32>
    %191 = arith.addf %190, %189 : vector<2x32xf32>
    %192 = arith.divf %190, %191 : vector<2x32xf32>
    %193 = vector.extract_strided_slice %186 {offsets = [0, 32], sizes = [2, 32], strides = [1, 1]} : vector<2x128xf32> to vector<2x32xf32>
    %194 = arith.negf %193 : vector<2x32xf32>
    %195 = math.exp %194 : vector<2x32xf32>
    %cst_57 = arith.constant 1.000000e+00 : f32
    %196 = vector.broadcast %cst_57 : f32 to vector<2x32xf32>
    %197 = arith.addf %196, %195 : vector<2x32xf32>
    %198 = arith.divf %196, %197 : vector<2x32xf32>
    %199 = vector.extract_strided_slice %186 {offsets = [0, 64], sizes = [2, 32], strides = [1, 1]} : vector<2x128xf32> to vector<2x32xf32>
    %200 = math.tanh %199 : vector<2x32xf32>
    %201 = vector.extract_strided_slice %186 {offsets = [0, 96], sizes = [2, 32], strides = [1, 1]} : vector<2x128xf32> to vector<2x32xf32>
    %202 = arith.negf %201 : vector<2x32xf32>
    %203 = math.exp %202 : vector<2x32xf32>
    %cst_58 = arith.constant 1.000000e+00 : f32
    %204 = vector.broadcast %cst_58 : f32 to vector<2x32xf32>
    %205 = arith.addf %204, %203 : vector<2x32xf32>
    %206 = arith.divf %204, %205 : vector<2x32xf32>
    %207 = arith.mulf %198, %180 : vector<2x32xf32>
    %208 = arith.mulf %192, %200 : vector<2x32xf32>
    %209 = arith.addf %207, %208 : vector<2x32xf32>
    %210 = math.tanh %209 : vector<2x32xf32>
    %211 = arith.mulf %206, %210 : vector<2x32xf32>
    %c12_59 = arith.constant 12 : index
    %c0_60 = arith.constant 0 : index
    %212 = vector.load %arg10[%c12_59, %c0_60] : memref<16x32xf32, #tpu.memory_space<vmem>>, vector<2x32xf32>
    tpu.vector_store %arg10[%c12_59, %c0_60], %211 {strides = array<i32>} : memref<16x32xf32, #tpu.memory_space<vmem>>, vector<2x32xf32>,
    %c14 = arith.constant 14 : index
    %c0_61 = arith.constant 0 : index
    %213 = vector.load %arg11[%c14, %c0_61] : memref<16x128xf32, #tpu.memory_space<vmem>>, vector<2x128xf32>
    %cst_62 = arith.constant dense<0.000000e+00> : vector<2x128xf32>
    %214 = tpu.matmul %211, %1, %cst_62 {dimension_numbers = #tpu.dot_dimension_numbers<[1], [0], [0], [1], [0, 0, 1, 1], [], []>} : vector<2x32xf32>, vector<32x128xf32>, vector<2x128xf32> -> vector<2x128xf32>
    %215 = arith.addf %213, %214 : vector<2x128xf32>
    %216 = vector.extract_strided_slice %215 {offsets = [0, 0], sizes = [2, 32], strides = [1, 1]} : vector<2x128xf32> to vector<2x32xf32>
    %217 = arith.negf %216 : vector<2x32xf32>
    %218 = math.exp %217 : vector<2x32xf32>
    %cst_63 = arith.constant 1.000000e+00 : f32
    %219 = vector.broadcast %cst_63 : f32 to vector<2x32xf32>
    %220 = arith.addf %219, %218 : vector<2x32xf32>
    %221 = arith.divf %219, %220 : vector<2x32xf32>
    %222 = vector.extract_strided_slice %215 {offsets = [0, 32], sizes = [2, 32], strides = [1, 1]} : vector<2x128xf32> to vector<2x32xf32>
    %223 = arith.negf %222 : vector<2x32xf32>
    %224 = math.exp %223 : vector<2x32xf32>
    %cst_64 = arith.constant 1.000000e+00 : f32
    %225 = vector.broadcast %cst_64 : f32 to vector<2x32xf32>
    %226 = arith.addf %225, %224 : vector<2x32xf32>
    %227 = arith.divf %225, %226 : vector<2x32xf32>
    %228 = vector.extract_strided_slice %215 {offsets = [0, 64], sizes = [2, 32], strides = [1, 1]} : vector<2x128xf32> to vector<2x32xf32>
    %229 = math.tanh %228 : vector<2x32xf32>
    %230 = vector.extract_strided_slice %215 {offsets = [0, 96], sizes = [2, 32], strides = [1, 1]} : vector<2x128xf32> to vector<2x32xf32>
    %231 = arith.negf %230 : vector<2x32xf32>
    %232 = math.exp %231 : vector<2x32xf32>
    %cst_65 = arith.constant 1.000000e+00 : f32
    %233 = vector.broadcast %cst_65 : f32 to vector<2x32xf32>
    %234 = arith.addf %233, %232 : vector<2x32xf32>
    %235 = arith.divf %233, %234 : vector<2x32xf32>
    %236 = arith.mulf %227, %209 : vector<2x32xf32>
    %237 = arith.mulf %221, %229 : vector<2x32xf32>
    %238 = arith.addf %236, %237 : vector<2x32xf32>
    %239 = math.tanh %238 : vector<2x32xf32>
    %240 = arith.mulf %235, %239 : vector<2x32xf32>
    %c14_66 = arith.constant 14 : index
    %c0_67 = arith.constant 0 : index
    %241 = vector.load %arg10[%c14_66, %c0_67] : memref<16x32xf32, #tpu.memory_space<vmem>>, vector<2x32xf32>
    tpu.vector_store %arg10[%c14_66, %c0_67], %240 {strides = array<i32>} : memref<16x32xf32, #tpu.memory_space<vmem>>, vector<2x32xf32>,
    %c0_68 = arith.constant 0 : index
    %c0_69 = arith.constant 0 : index
    %242 = vector.load %arg4[%c0_68, %c0_69] : memref<32x128xf32, #tpu.memory_space<vmem>>, vector<32x128xf32>
    %c0_70 = arith.constant 0 : index
    %c0_71 = arith.constant 0 : index
    %243 = vector.load %arg5[%c0_70, %c0_71] : memref<32x128xf32, #tpu.memory_space<vmem>>, vector<32x128xf32>
    %c0_72 = arith.constant 0 : index
    %c0_73 = arith.constant 0 : index
    %244 = vector.load %arg6[%c0_72, %c0_73] : memref<1x128xf32, #tpu.memory_space<vmem>>, vector<1x128xf32>
    %c0_74 = arith.constant 0 : index
    %c0_75 = arith.constant 0 : index
    %245 = vector.load %arg10[%c0_74, %c0_75] : memref<16x32xf32, #tpu.memory_space<vmem>>, vector<16x32xf32>
    %cst_76 = arith.constant dense<0.000000e+00> : vector<16x128xf32>
    %246 = tpu.matmul %245, %242, %cst_76 {dimension_numbers = #tpu.dot_dimension_numbers<[1], [0], [0], [1], [0, 0, 1, 1], [], []>} : vector<16x32xf32>, vector<32x128xf32>, vector<16x128xf32> -> vector<16x128xf32>
    %247 = vector.broadcast %244 : vector<1x128xf32> to vector<16x128xf32>
    %248 = arith.addf %246, %247 : vector<16x128xf32>
    %c0_77 = arith.constant 0 : index
    %c0_78 = arith.constant 0 : index
    %249 = vector.load %arg11[%c0_77, %c0_78] : memref<16x128xf32, #tpu.memory_space<vmem>>, vector<16x128xf32>
    tpu.vector_store %arg11[%c0_77, %c0_78], %248 {strides = array<i32>} : memref<16x128xf32, #tpu.memory_space<vmem>>, vector<16x128xf32>,
    %cst_79 = arith.constant 0.000000e+00 : f32
    %250 = vector.broadcast %cst_79 : f32 to vector<2x32xf32>
    %cst_80 = arith.constant 0.000000e+00 : f32
    %251 = vector.broadcast %cst_80 : f32 to vector<2x32xf32>
    %c0_81 = arith.constant 0 : index
    %c0_82 = arith.constant 0 : index
    %252 = vector.load %arg11[%c0_81, %c0_82] : memref<16x128xf32, #tpu.memory_space<vmem>>, vector<2x128xf32>
    %cst_83 = arith.constant dense<0.000000e+00> : vector<2x128xf32>
    %253 = tpu.matmul %250, %243, %cst_83 {dimension_numbers = #tpu.dot_dimension_numbers<[1], [0], [0], [1], [0, 0, 1, 1], [], []>} : vector<2x32xf32>, vector<32x128xf32>, vector<2x128xf32> -> vector<2x128xf32>
    %254 = arith.addf %252, %253 : vector<2x128xf32>
    %255 = vector.extract_strided_slice %254 {offsets = [0, 0], sizes = [2, 32], strides = [1, 1]} : vector<2x128xf32> to vector<2x32xf32>
    %256 = arith.negf %255 : vector<2x32xf32>
    %257 = math.exp %256 : vector<2x32xf32>
    %cst_84 = arith.constant 1.000000e+00 : f32
    %258 = vector.broadcast %cst_84 : f32 to vector<2x32xf32>
    %259 = arith.addf %258, %257 : vector<2x32xf32>
    %260 = arith.divf %258, %259 : vector<2x32xf32>
    %261 = vector.extract_strided_slice %254 {offsets = [0, 32], sizes = [2, 32], strides = [1, 1]} : vector<2x128xf32> to vector<2x32xf32>
    %262 = arith.negf %261 : vector<2x32xf32>
    %263 = math.exp %262 : vector<2x32xf32>
    %cst_85 = arith.constant 1.000000e+00 : f32
    %264 = vector.broadcast %cst_85 : f32 to vector<2x32xf32>
    %265 = arith.addf %264, %263 : vector<2x32xf32>
    %266 = arith.divf %264, %265 : vector<2x32xf32>
    %267 = vector.extract_strided_slice %254 {offsets = [0, 64], sizes = [2, 32], strides = [1, 1]} : vector<2x128xf32> to vector<2x32xf32>
    %268 = math.tanh %267 : vector<2x32xf32>
    %269 = vector.extract_strided_slice %254 {offsets = [0, 96], sizes = [2, 32], strides = [1, 1]} : vector<2x128xf32> to vector<2x32xf32>
    %270 = arith.negf %269 : vector<2x32xf32>
    %271 = math.exp %270 : vector<2x32xf32>
    %cst_86 = arith.constant 1.000000e+00 : f32
    %272 = vector.broadcast %cst_86 : f32 to vector<2x32xf32>
    %273 = arith.addf %272, %271 : vector<2x32xf32>
    %274 = arith.divf %272, %273 : vector<2x32xf32>
    %275 = arith.mulf %266, %251 : vector<2x32xf32>
    %276 = arith.mulf %260, %268 : vector<2x32xf32>
    %277 = arith.addf %275, %276 : vector<2x32xf32>
    %278 = math.tanh %277 : vector<2x32xf32>
    %279 = arith.mulf %274, %278 : vector<2x32xf32>
    %c2_87 = arith.constant 2 : index
    %c0_88 = arith.constant 0 : index
    %280 = vector.load %arg11[%c2_87, %c0_88] : memref<16x128xf32, #tpu.memory_space<vmem>>, vector<2x128xf32>
    %cst_89 = arith.constant dense<0.000000e+00> : vector<2x128xf32>
    %281 = tpu.matmul %279, %243, %cst_89 {dimension_numbers = #tpu.dot_dimension_numbers<[1], [0], [0], [1], [0, 0, 1, 1], [], []>} : vector<2x32xf32>, vector<32x128xf32>, vector<2x128xf32> -> vector<2x128xf32>
    %282 = arith.addf %280, %281 : vector<2x128xf32>
    %283 = vector.extract_strided_slice %282 {offsets = [0, 0], sizes = [2, 32], strides = [1, 1]} : vector<2x128xf32> to vector<2x32xf32>
    %284 = arith.negf %283 : vector<2x32xf32>
    %285 = math.exp %284 : vector<2x32xf32>
    %cst_90 = arith.constant 1.000000e+00 : f32
    %286 = vector.broadcast %cst_90 : f32 to vector<2x32xf32>
    %287 = arith.addf %286, %285 : vector<2x32xf32>
    %288 = arith.divf %286, %287 : vector<2x32xf32>
    %289 = vector.extract_strided_slice %282 {offsets = [0, 32], sizes = [2, 32], strides = [1, 1]} : vector<2x128xf32> to vector<2x32xf32>
    %290 = arith.negf %289 : vector<2x32xf32>
    %291 = math.exp %290 : vector<2x32xf32>
    %cst_91 = arith.constant 1.000000e+00 : f32
    %292 = vector.broadcast %cst_91 : f32 to vector<2x32xf32>
    %293 = arith.addf %292, %291 : vector<2x32xf32>
    %294 = arith.divf %292, %293 : vector<2x32xf32>
    %295 = vector.extract_strided_slice %282 {offsets = [0, 64], sizes = [2, 32], strides = [1, 1]} : vector<2x128xf32> to vector<2x32xf32>
    %296 = math.tanh %295 : vector<2x32xf32>
    %297 = vector.extract_strided_slice %282 {offsets = [0, 96], sizes = [2, 32], strides = [1, 1]} : vector<2x128xf32> to vector<2x32xf32>
    %298 = arith.negf %297 : vector<2x32xf32>
    %299 = math.exp %298 : vector<2x32xf32>
    %cst_92 = arith.constant 1.000000e+00 : f32
    %300 = vector.broadcast %cst_92 : f32 to vector<2x32xf32>
    %301 = arith.addf %300, %299 : vector<2x32xf32>
    %302 = arith.divf %300, %301 : vector<2x32xf32>
    %303 = arith.mulf %294, %277 : vector<2x32xf32>
    %304 = arith.mulf %288, %296 : vector<2x32xf32>
    %305 = arith.addf %303, %304 : vector<2x32xf32>
    %306 = math.tanh %305 : vector<2x32xf32>
    %307 = arith.mulf %302, %306 : vector<2x32xf32>
    %c4_93 = arith.constant 4 : index
    %c0_94 = arith.constant 0 : index
    %308 = vector.load %arg11[%c4_93, %c0_94] : memref<16x128xf32, #tpu.memory_space<vmem>>, vector<2x128xf32>
    %cst_95 = arith.constant dense<0.000000e+00> : vector<2x128xf32>
    %309 = tpu.matmul %307, %243, %cst_95 {dimension_numbers = #tpu.dot_dimension_numbers<[1], [0], [0], [1], [0, 0, 1, 1], [], []>} : vector<2x32xf32>, vector<32x128xf32>, vector<2x128xf32> -> vector<2x128xf32>
    %310 = arith.addf %308, %309 : vector<2x128xf32>
    %311 = vector.extract_strided_slice %310 {offsets = [0, 0], sizes = [2, 32], strides = [1, 1]} : vector<2x128xf32> to vector<2x32xf32>
    %312 = arith.negf %311 : vector<2x32xf32>
    %313 = math.exp %312 : vector<2x32xf32>
    %cst_96 = arith.constant 1.000000e+00 : f32
    %314 = vector.broadcast %cst_96 : f32 to vector<2x32xf32>
    %315 = arith.addf %314, %313 : vector<2x32xf32>
    %316 = arith.divf %314, %315 : vector<2x32xf32>
    %317 = vector.extract_strided_slice %310 {offsets = [0, 32], sizes = [2, 32], strides = [1, 1]} : vector<2x128xf32> to vector<2x32xf32>
    %318 = arith.negf %317 : vector<2x32xf32>
    %319 = math.exp %318 : vector<2x32xf32>
    %cst_97 = arith.constant 1.000000e+00 : f32
    %320 = vector.broadcast %cst_97 : f32 to vector<2x32xf32>
    %321 = arith.addf %320, %319 : vector<2x32xf32>
    %322 = arith.divf %320, %321 : vector<2x32xf32>
    %323 = vector.extract_strided_slice %310 {offsets = [0, 64], sizes = [2, 32], strides = [1, 1]} : vector<2x128xf32> to vector<2x32xf32>
    %324 = math.tanh %323 : vector<2x32xf32>
    %325 = vector.extract_strided_slice %310 {offsets = [0, 96], sizes = [2, 32], strides = [1, 1]} : vector<2x128xf32> to vector<2x32xf32>
    %326 = arith.negf %325 : vector<2x32xf32>
    %327 = math.exp %326 : vector<2x32xf32>
    %cst_98 = arith.constant 1.000000e+00 : f32
    %328 = vector.broadcast %cst_98 : f32 to vector<2x32xf32>
    %329 = arith.addf %328, %327 : vector<2x32xf32>
    %330 = arith.divf %328, %329 : vector<2x32xf32>
    %331 = arith.mulf %322, %305 : vector<2x32xf32>
    %332 = arith.mulf %316, %324 : vector<2x32xf32>
    %333 = arith.addf %331, %332 : vector<2x32xf32>
    %334 = math.tanh %333 : vector<2x32xf32>
    %335 = arith.mulf %330, %334 : vector<2x32xf32>
    %c6_99 = arith.constant 6 : index
    %c0_100 = arith.constant 0 : index
    %336 = vector.load %arg11[%c6_99, %c0_100] : memref<16x128xf32, #tpu.memory_space<vmem>>, vector<2x128xf32>
    %cst_101 = arith.constant dense<0.000000e+00> : vector<2x128xf32>
    %337 = tpu.matmul %335, %243, %cst_101 {dimension_numbers = #tpu.dot_dimension_numbers<[1], [0], [0], [1], [0, 0, 1, 1], [], []>} : vector<2x32xf32>, vector<32x128xf32>, vector<2x128xf32> -> vector<2x128xf32>
    %338 = arith.addf %336, %337 : vector<2x128xf32>
    %339 = vector.extract_strided_slice %338 {offsets = [0, 0], sizes = [2, 32], strides = [1, 1]} : vector<2x128xf32> to vector<2x32xf32>
    %340 = arith.negf %339 : vector<2x32xf32>
    %341 = math.exp %340 : vector<2x32xf32>
    %cst_102 = arith.constant 1.000000e+00 : f32
    %342 = vector.broadcast %cst_102 : f32 to vector<2x32xf32>
    %343 = arith.addf %342, %341 : vector<2x32xf32>
    %344 = arith.divf %342, %343 : vector<2x32xf32>
    %345 = vector.extract_strided_slice %338 {offsets = [0, 32], sizes = [2, 32], strides = [1, 1]} : vector<2x128xf32> to vector<2x32xf32>
    %346 = arith.negf %345 : vector<2x32xf32>
    %347 = math.exp %346 : vector<2x32xf32>
    %cst_103 = arith.constant 1.000000e+00 : f32
    %348 = vector.broadcast %cst_103 : f32 to vector<2x32xf32>
    %349 = arith.addf %348, %347 : vector<2x32xf32>
    %350 = arith.divf %348, %349 : vector<2x32xf32>
    %351 = vector.extract_strided_slice %338 {offsets = [0, 64], sizes = [2, 32], strides = [1, 1]} : vector<2x128xf32> to vector<2x32xf32>
    %352 = math.tanh %351 : vector<2x32xf32>
    %353 = vector.extract_strided_slice %338 {offsets = [0, 96], sizes = [2, 32], strides = [1, 1]} : vector<2x128xf32> to vector<2x32xf32>
    %354 = arith.negf %353 : vector<2x32xf32>
    %355 = math.exp %354 : vector<2x32xf32>
    %cst_104 = arith.constant 1.000000e+00 : f32
    %356 = vector.broadcast %cst_104 : f32 to vector<2x32xf32>
    %357 = arith.addf %356, %355 : vector<2x32xf32>
    %358 = arith.divf %356, %357 : vector<2x32xf32>
    %359 = arith.mulf %350, %333 : vector<2x32xf32>
    %360 = arith.mulf %344, %352 : vector<2x32xf32>
    %361 = arith.addf %359, %360 : vector<2x32xf32>
    %362 = math.tanh %361 : vector<2x32xf32>
    %363 = arith.mulf %358, %362 : vector<2x32xf32>
    %c8_105 = arith.constant 8 : index
    %c0_106 = arith.constant 0 : index
    %364 = vector.load %arg11[%c8_105, %c0_106] : memref<16x128xf32, #tpu.memory_space<vmem>>, vector<2x128xf32>
    %cst_107 = arith.constant dense<0.000000e+00> : vector<2x128xf32>
    %365 = tpu.matmul %363, %243, %cst_107 {dimension_numbers = #tpu.dot_dimension_numbers<[1], [0], [0], [1], [0, 0, 1, 1], [], []>} : vector<2x32xf32>, vector<32x128xf32>, vector<2x128xf32> -> vector<2x128xf32>
    %366 = arith.addf %364, %365 : vector<2x128xf32>
    %367 = vector.extract_strided_slice %366 {offsets = [0, 0], sizes = [2, 32], strides = [1, 1]} : vector<2x128xf32> to vector<2x32xf32>
    %368 = arith.negf %367 : vector<2x32xf32>
    %369 = math.exp %368 : vector<2x32xf32>
    %cst_108 = arith.constant 1.000000e+00 : f32
    %370 = vector.broadcast %cst_108 : f32 to vector<2x32xf32>
    %371 = arith.addf %370, %369 : vector<2x32xf32>
    %372 = arith.divf %370, %371 : vector<2x32xf32>
    %373 = vector.extract_strided_slice %366 {offsets = [0, 32], sizes = [2, 32], strides = [1, 1]} : vector<2x128xf32> to vector<2x32xf32>
    %374 = arith.negf %373 : vector<2x32xf32>
    %375 = math.exp %374 : vector<2x32xf32>
    %cst_109 = arith.constant 1.000000e+00 : f32
    %376 = vector.broadcast %cst_109 : f32 to vector<2x32xf32>
    %377 = arith.addf %376, %375 : vector<2x32xf32>
    %378 = arith.divf %376, %377 : vector<2x32xf32>
    %379 = vector.extract_strided_slice %366 {offsets = [0, 64], sizes = [2, 32], strides = [1, 1]} : vector<2x128xf32> to vector<2x32xf32>
    %380 = math.tanh %379 : vector<2x32xf32>
    %381 = vector.extract_strided_slice %366 {offsets = [0, 96], sizes = [2, 32], strides = [1, 1]} : vector<2x128xf32> to vector<2x32xf32>
    %382 = arith.negf %381 : vector<2x32xf32>
    %383 = math.exp %382 : vector<2x32xf32>
    %cst_110 = arith.constant 1.000000e+00 : f32
    %384 = vector.broadcast %cst_110 : f32 to vector<2x32xf32>
    %385 = arith.addf %384, %383 : vector<2x32xf32>
    %386 = arith.divf %384, %385 : vector<2x32xf32>
    %387 = arith.mulf %378, %361 : vector<2x32xf32>
    %388 = arith.mulf %372, %380 : vector<2x32xf32>
    %389 = arith.addf %387, %388 : vector<2x32xf32>
    %390 = math.tanh %389 : vector<2x32xf32>
    %391 = arith.mulf %386, %390 : vector<2x32xf32>
    %c10_111 = arith.constant 10 : index
    %c0_112 = arith.constant 0 : index
    %392 = vector.load %arg11[%c10_111, %c0_112] : memref<16x128xf32, #tpu.memory_space<vmem>>, vector<2x128xf32>
    %cst_113 = arith.constant dense<0.000000e+00> : vector<2x128xf32>
    %393 = tpu.matmul %391, %243, %cst_113 {dimension_numbers = #tpu.dot_dimension_numbers<[1], [0], [0], [1], [0, 0, 1, 1], [], []>} : vector<2x32xf32>, vector<32x128xf32>, vector<2x128xf32> -> vector<2x128xf32>
    %394 = arith.addf %392, %393 : vector<2x128xf32>
    %395 = vector.extract_strided_slice %394 {offsets = [0, 0], sizes = [2, 32], strides = [1, 1]} : vector<2x128xf32> to vector<2x32xf32>
    %396 = arith.negf %395 : vector<2x32xf32>
    %397 = math.exp %396 : vector<2x32xf32>
    %cst_114 = arith.constant 1.000000e+00 : f32
    %398 = vector.broadcast %cst_114 : f32 to vector<2x32xf32>
    %399 = arith.addf %398, %397 : vector<2x32xf32>
    %400 = arith.divf %398, %399 : vector<2x32xf32>
    %401 = vector.extract_strided_slice %394 {offsets = [0, 32], sizes = [2, 32], strides = [1, 1]} : vector<2x128xf32> to vector<2x32xf32>
    %402 = arith.negf %401 : vector<2x32xf32>
    %403 = math.exp %402 : vector<2x32xf32>
    %cst_115 = arith.constant 1.000000e+00 : f32
    %404 = vector.broadcast %cst_115 : f32 to vector<2x32xf32>
    %405 = arith.addf %404, %403 : vector<2x32xf32>
    %406 = arith.divf %404, %405 : vector<2x32xf32>
    %407 = vector.extract_strided_slice %394 {offsets = [0, 64], sizes = [2, 32], strides = [1, 1]} : vector<2x128xf32> to vector<2x32xf32>
    %408 = math.tanh %407 : vector<2x32xf32>
    %409 = vector.extract_strided_slice %394 {offsets = [0, 96], sizes = [2, 32], strides = [1, 1]} : vector<2x128xf32> to vector<2x32xf32>
    %410 = arith.negf %409 : vector<2x32xf32>
    %411 = math.exp %410 : vector<2x32xf32>
    %cst_116 = arith.constant 1.000000e+00 : f32
    %412 = vector.broadcast %cst_116 : f32 to vector<2x32xf32>
    %413 = arith.addf %412, %411 : vector<2x32xf32>
    %414 = arith.divf %412, %413 : vector<2x32xf32>
    %415 = arith.mulf %406, %389 : vector<2x32xf32>
    %416 = arith.mulf %400, %408 : vector<2x32xf32>
    %417 = arith.addf %415, %416 : vector<2x32xf32>
    %418 = math.tanh %417 : vector<2x32xf32>
    %419 = arith.mulf %414, %418 : vector<2x32xf32>
    %c12_117 = arith.constant 12 : index
    %c0_118 = arith.constant 0 : index
    %420 = vector.load %arg11[%c12_117, %c0_118] : memref<16x128xf32, #tpu.memory_space<vmem>>, vector<2x128xf32>
    %cst_119 = arith.constant dense<0.000000e+00> : vector<2x128xf32>
    %421 = tpu.matmul %419, %243, %cst_119 {dimension_numbers = #tpu.dot_dimension_numbers<[1], [0], [0], [1], [0, 0, 1, 1], [], []>} : vector<2x32xf32>, vector<32x128xf32>, vector<2x128xf32> -> vector<2x128xf32>
    %422 = arith.addf %420, %421 : vector<2x128xf32>
    %423 = vector.extract_strided_slice %422 {offsets = [0, 0], sizes = [2, 32], strides = [1, 1]} : vector<2x128xf32> to vector<2x32xf32>
    %424 = arith.negf %423 : vector<2x32xf32>
    %425 = math.exp %424 : vector<2x32xf32>
    %cst_120 = arith.constant 1.000000e+00 : f32
    %426 = vector.broadcast %cst_120 : f32 to vector<2x32xf32>
    %427 = arith.addf %426, %425 : vector<2x32xf32>
    %428 = arith.divf %426, %427 : vector<2x32xf32>
    %429 = vector.extract_strided_slice %422 {offsets = [0, 32], sizes = [2, 32], strides = [1, 1]} : vector<2x128xf32> to vector<2x32xf32>
    %430 = arith.negf %429 : vector<2x32xf32>
    %431 = math.exp %430 : vector<2x32xf32>
    %cst_121 = arith.constant 1.000000e+00 : f32
    %432 = vector.broadcast %cst_121 : f32 to vector<2x32xf32>
    %433 = arith.addf %432, %431 : vector<2x32xf32>
    %434 = arith.divf %432, %433 : vector<2x32xf32>
    %435 = vector.extract_strided_slice %422 {offsets = [0, 64], sizes = [2, 32], strides = [1, 1]} : vector<2x128xf32> to vector<2x32xf32>
    %436 = math.tanh %435 : vector<2x32xf32>
    %437 = vector.extract_strided_slice %422 {offsets = [0, 96], sizes = [2, 32], strides = [1, 1]} : vector<2x128xf32> to vector<2x32xf32>
    %438 = arith.negf %437 : vector<2x32xf32>
    %439 = math.exp %438 : vector<2x32xf32>
    %cst_122 = arith.constant 1.000000e+00 : f32
    %440 = vector.broadcast %cst_122 : f32 to vector<2x32xf32>
    %441 = arith.addf %440, %439 : vector<2x32xf32>
    %442 = arith.divf %440, %441 : vector<2x32xf32>
    %443 = arith.mulf %434, %417 : vector<2x32xf32>
    %444 = arith.mulf %428, %436 : vector<2x32xf32>
    %445 = arith.addf %443, %444 : vector<2x32xf32>
    %446 = math.tanh %445 : vector<2x32xf32>
    %447 = arith.mulf %442, %446 : vector<2x32xf32>
    %c14_123 = arith.constant 14 : index
    %c0_124 = arith.constant 0 : index
    %448 = vector.load %arg11[%c14_123, %c0_124] : memref<16x128xf32, #tpu.memory_space<vmem>>, vector<2x128xf32>
    %cst_125 = arith.constant dense<0.000000e+00> : vector<2x128xf32>
    %449 = tpu.matmul %447, %243, %cst_125 {dimension_numbers = #tpu.dot_dimension_numbers<[1], [0], [0], [1], [0, 0, 1, 1], [], []>} : vector<2x32xf32>, vector<32x128xf32>, vector<2x128xf32> -> vector<2x128xf32>
    %450 = arith.addf %448, %449 : vector<2x128xf32>
    %451 = vector.extract_strided_slice %450 {offsets = [0, 0], sizes = [2, 32], strides = [1, 1]} : vector<2x128xf32> to vector<2x32xf32>
    %452 = arith.negf %451 : vector<2x32xf32>
    %453 = math.exp %452 : vector<2x32xf32>
    %cst_126 = arith.constant 1.000000e+00 : f32
    %454 = vector.broadcast %cst_126 : f32 to vector<2x32xf32>
    %455 = arith.addf %454, %453 : vector<2x32xf32>
    %456 = arith.divf %454, %455 : vector<2x32xf32>
    %457 = vector.extract_strided_slice %450 {offsets = [0, 32], sizes = [2, 32], strides = [1, 1]} : vector<2x128xf32> to vector<2x32xf32>
    %458 = arith.negf %457 : vector<2x32xf32>
    %459 = math.exp %458 : vector<2x32xf32>
    %cst_127 = arith.constant 1.000000e+00 : f32
    %460 = vector.broadcast %cst_127 : f32 to vector<2x32xf32>
    %461 = arith.addf %460, %459 : vector<2x32xf32>
    %462 = arith.divf %460, %461 : vector<2x32xf32>
    %463 = vector.extract_strided_slice %450 {offsets = [0, 64], sizes = [2, 32], strides = [1, 1]} : vector<2x128xf32> to vector<2x32xf32>
    %464 = math.tanh %463 : vector<2x32xf32>
    %465 = vector.extract_strided_slice %450 {offsets = [0, 96], sizes = [2, 32], strides = [1, 1]} : vector<2x128xf32> to vector<2x32xf32>
    %466 = arith.negf %465 : vector<2x32xf32>
    %467 = math.exp %466 : vector<2x32xf32>
    %cst_128 = arith.constant 1.000000e+00 : f32
    %468 = vector.broadcast %cst_128 : f32 to vector<2x32xf32>
    %469 = arith.addf %468, %467 : vector<2x32xf32>
    %470 = arith.divf %468, %469 : vector<2x32xf32>
    %471 = arith.mulf %462, %445 : vector<2x32xf32>
    %472 = arith.mulf %456, %464 : vector<2x32xf32>
    %473 = arith.addf %471, %472 : vector<2x32xf32>
    %474 = math.tanh %473 : vector<2x32xf32>
    %475 = arith.mulf %470, %474 : vector<2x32xf32>
    %c0_129 = arith.constant 0 : index
    %c0_130 = arith.constant 0 : index
    %476 = vector.load %arg7[%c0_129, %c0_130] : memref<32x5xf32, #tpu.memory_space<vmem>>, vector<32x5xf32>
    %cst_131 = arith.constant dense<0.000000e+00> : vector<2x5xf32>
    %477 = tpu.matmul %475, %476, %cst_131 {dimension_numbers = #tpu.dot_dimension_numbers<[1], [0], [0], [1], [0, 0, 1, 1], [], []>} : vector<2x32xf32>, vector<32x5xf32>, vector<2x5xf32> -> vector<2x5xf32>
    %c0_132 = arith.constant 0 : index
    %c0_133 = arith.constant 0 : index
    %478 = vector.load %arg8[%c0_132, %c0_133] : memref<1x5xf32, #tpu.memory_space<vmem>>, vector<1x5xf32>
    %479 = vector.broadcast %478 : vector<1x5xf32> to vector<2x5xf32>
    %480 = arith.addf %477, %479 : vector<2x5xf32>
    %c0_134 = arith.constant 0 : index
    %c0_135 = arith.constant 0 : index
    %481 = vector.load %arg9[%c0_134, %c0_135] : memref<2x5xf32, #tpu.memory_space<vmem>>, vector<2x5xf32>
    tpu.vector_store %arg9[%c0_134, %c0_135], %480 {strides = array<i32>} : memref<2x5xf32, #tpu.memory_space<vmem>>, vector<2x5xf32>,
    return
  }
}

</mosaic_0001>

<bundles_post_ra>
// kernel: tpu_custom_call.1
= control target key start
LH: loop header
LB: loop body
LE: loop exit
PB: predicated region body
PF: predicated region fallthrough
CT: control target
= control target key end

     0   :  { %14 = vsyncpa [#allocation5], 0  ;;  %s1850_s0 = inlined_call_operand.hbm [shape: f32[16,16], index: 0, kind: input, shape index: {}]   ;;  %s1851_s1 = inlined_call_operand.hbm [shape: f32[16,128], index: 1, kind: input, shape index: {}]   ;;  %s1852_s2 = inlined_call_operand.vmem [shape: f32[32,128], index: 2, kind: input, shape index: {}]   ;;  %s1853_s3 = inlined_call_operand.vmem [shape: f32[1,128], index: 3, kind: input, shape index: {}]   ;;  %s1854_s4 = inlined_call_operand.hbm [shape: f32[32,128], index: 4, kind: input, shape index: {}]   ;;  %s1855_s5 = inlined_call_operand.hbm [shape: f32[32,128], index: 5, kind: input, shape index: {}]   ;;  %s1856_s6 = inlined_call_operand.vmem [shape: f32[1,128], index: 6, kind: input, shape index: {}]   ;;  %s1857_s7 = inlined_call_operand.vmem [shape: f32[32,5], index: 7, kind: input, shape index: {}]   ;;  %s1858_s8 = inlined_call_operand.vmem [shape: f32[1,5], index: 8, kind: input, shape index: {}]   ;;  %s1859_s9 = inlined_call_operand.hbm [shape: f32[2,5], index: 9, kind: output, shape index: {}]  }
   0x1   :  { %15 = vsyncpa [#allocation8], 0 }
   0x2   :  { %16 = vsyncpa [#allocation11], 0 }
   0x3   :  { %17 = vsyncpa [#allocation6], 0  ;;  %s35_s11 = sshll.u32 %s1851_s1, 4  ;;  %s1581_s12 = smov [#allocation7]   ;;  %s36_s11 = int_to_ptr.hbm [resolvable:$true] %s35_s11 }
   0x4   :  { %s37_s13 = sshll.u32 %s1581_s12, 4  ;;  %s22_s16 = sshll.u32 %s1850_s0, 4  ;;  %s38_s13 = int_to_ptr.vmem [resolvable:$true] %s37_s13  ;;  %s23_s16 = int_to_ptr.hbm [resolvable:$true] %s22_s16 }
   0x5   :  { %s1582_s17 = smov 128   ;;  %s1583_s18 = smov 8  }
   0x6   :  { %43 = dma.hbm_to_vmem [thread:$0]  %s36_s11, 256, %s38_s13, [#allocation8], %s1582_s17, %s1582_s17, %s1583_s18  }
   0x7   :  { %s1584_s19 = smov [#allocation4]   ;;  %s52_s23 = sshll.u32 %s1854_s4, 4  ;;  %s53_s23 = int_to_ptr.hbm [resolvable:$true] %s52_s23 }
   0x8   :  { %s24_s20 = sshll.u32 %s1584_s19, 4  ;;  %s65_s25 = sshll.u32 %s1855_s5, 4  ;;  %s25_s20 = int_to_ptr.vmem [resolvable:$true] %s24_s20  ;;  %s66_s25 = int_to_ptr.hbm [resolvable:$true] %s65_s25 }
   0x9   :  { %30 = dma.hbm_to_vmem [thread:$0]  %s23_s16, 256, %s25_s20, [#allocation5], %s1582_s17, %s1582_s17, %s1583_s18  }
   0xa   :  { %s1585_s26 = smov [#allocation9]   ;;  %s1586_s0 = smov [#allocation10]  }
   0xb   :  { %s54_s27 = sshll.u32 %s1585_s26, 4  ;;  %s67_s28 = sshll.u32 %s1586_s0, 4  ;;  %s55_s27 = int_to_ptr.vmem [resolvable:$true] %s54_s27  ;;  %s68_s28 = int_to_ptr.vmem [resolvable:$true] %s67_s28 }
   0xc   :  { %60 = dma.hbm_to_vmem [thread:$0]  %s53_s23, 512, %s55_s27, [#allocation8], %s1582_s17, %s1582_s17, %s1583_s18  }
   0xd   :  { %73 = dma.hbm_to_vmem [thread:$0]  %s66_s25, 512, %s68_s28, [#allocation11], %s1582_s17, %s1582_s17, %s1583_s18  }
   0xe   :  { %1573 = dma.done.wait [#allocation5], 256  }
   0xf   :  { %1574 = vsyncadd [#allocation5], 4294967040 }
  0x10   :  { %1575 = dma.done.wait [#allocation8], 768  }
  0x11   :  { %1576 = vsyncadd [#allocation8], 4294966528 }
  0x12   :  { %1577 = dma.done.wait [#allocation11], 512  }
  0x13   :  { %1578 = vsyncadd [#allocation11], 4294966784  ;;  %v97_v0 = vld [vmem:[#allocation7 + $0x8] sm:$0xff]  ;;  %v96_v1 = vld [vmem:[#allocation7] sm:$0xff]  ;;  %vm108_vm0 = vcmask 130048   ;;  %v1587_v7 = vmov 0.0  }
  0x14   :  { %129 = vmatpush.msra.mxu0 %v97_v0  ;;  %v103_v2 = vld [vmem:[#allocation4] sm:$0xff]  ;;  %v101_v3 = vld [vmem:[%s1852_s2 + $0x18] sm:$0xff]  ;;  %v100_v4 = vld [vmem:[%s1852_s2 + $0x10] sm:$0xff]  ;;  %s1588_s15 = smov 64   ;;  %vm207_vm5 = vcmask 254976   ;;  %vm141_vm6 = vcmask 261120  }
  0x15   :  { %157 = vmatpush.msra.mxu1 %v101_v3  ;;  %224 = vmatpush.msra.mxu2 %v101_v3  ;;  %v99_v5 = vld [vmem:[%s1852_s2 + $0x8] sm:$0xff]  ;;  %v98_v6 = vld [vmem:[%s1852_s2] sm:$0xff]  ;;  %s1590_s26 = smov [#allocation12]   ;;  %s1265_s4 = sshll.u32 %s1859_s9, 4  ;;  %s1266_s4 = int_to_ptr.hbm [resolvable:$true] %s1265_s4 }
  0x16   :  { %130 = vmatpush.msra.mxu0 %v96_v1  ;;  %290 = vmatpush.msra.mxu3 %v101_v3  ;;  %v1670_v8 = vld [vmem:[%s1853_s3] ss:$0 sm:$0xff]  ;;  %s1589_s3 = smov 32   ;;  %s1263_s27 = sshll.u32 %s1590_s26, 4  ;;  %s1264_s27 = int_to_ptr.vmem [resolvable:$true] %s1263_s27 }
  0x17   :  { %1277 = vmatmul.msk.f32.vlgmr.msra.gmra.mxu0 %vm108_vm0, %v103_v2  ;;  %158 = vmatpush.msra.mxu1 %v100_v4 }
  0x18   :  { %225 = vmatpush.msra.mxu2 %v100_v4  ;;  %291 = vmatpush.msra.mxu3 %v100_v4 }
  0x19   :  { %159 = vmatpush.msra.mxu1 %v99_v5  ;;  %554 = vmatpush.msrb.mxu0 %v101_v3 }
  0x1a   :  { %226 = vmatpush.msra.mxu2 %v99_v5  ;;  %292 = vmatpush.msra.mxu3 %v99_v5 }
  0x1b   :  { %160 = vmatpush.msra.mxu1 %v98_v6  ;;  %555 = vmatpush.msrb.mxu0 %v100_v4 }
  0x1c   :  { %161 = vmatmul.f32.vlgmr.msra.gmra.mxu1 %v1587_v7  ;;  %227 = vmatpush.msra.mxu2 %v98_v6 }
  0x1d   :  { %293 = vmatpush.msra.mxu3 %v98_v6  ;;  %356 = vmatpush.msrb.mxu1 %v101_v3 }
  0x1e   :  { %422 = vmatpush.msrb.mxu2 %v101_v3  ;;  %556 = vmatpush.msrb.mxu0 %v99_v5 }
  0x1f   :  { %488 = vmatpush.msrb.mxu3 %v101_v3  ;;  %357 = vmatpush.msrb.mxu1 %v100_v4 }
  0x20   :  { %423 = vmatpush.msrb.mxu2 %v100_v4  ;;  %557 = vmatpush.msrb.mxu0 %v98_v6 }
  0x21   :  { %489 = vmatpush.msrb.mxu3 %v100_v4  ;;  %358 = vmatpush.msrb.mxu1 %v99_v5 }
  0x22   :  { %424 = vmatpush.msrb.mxu2 %v99_v5 }
  0x23   :  { %490 = vmatpush.msrb.mxu3 %v99_v5  ;;  %359 = vmatpush.msrb.mxu1 %v98_v6 }
  0x24   :  { %425 = vmatpush.msrb.mxu2 %v98_v6 }
  0x25   :  { %491 = vmatpush.msrb.mxu3 %v98_v6  ;;  %620 = vmatpush.msra.mxu1 %v101_v3 }
  0x27   :  { %621 = vmatpush.msra.mxu1 %v100_v4 }
  0x29   :  { %622 = vmatpush.msra.mxu1 %v99_v5 }
  0x2b   :  { %623 = vmatpush.msra.mxu1 %v98_v6 }
  0x94   :  { %v132_v9 = vpop.f32.mrf.mxu0 }
  0x95   :  { %v133_v10 = vadd.f32 %v1670_v8, %v132_v9 }
  0x97   :  { %138 = vst [vmem:[#allocation3] sm:$0xff] %v133_v10 }
  0x99   :  { %v162_v11 = vpop.f32.mrf.mxu1 }
  0x9e   :  { %v140_v12 = vld [vmem:[#allocation3] sm:$0x3]  ;;  %v209_v37 = vld [vmem:[#allocation3 + $0x2] sm:$0x3]  ;;  %v275_v63 = vld [vmem:[#allocation3 + $0x4] sm:$0x3] }
  0x9f   :  { %v165_v13 = vadd.f32 %v162_v11, %v140_v12 }
  0xa1   :  { %1325 = vtanh.f32 %v165_v13  ;;  %v1279_v15 = vmul.f32 -1.442695, %v165_v13 }
  0xa3   :  { %1327 = vpow2.f32 %v1279_v15 }
  0xa7   :  { %v1326_v14 = vpop.eup %1325 }
  0xa8   :  { %188 = vrot.lane.b32.xlu0 %v1326_v14, %s1588_s15 }
  0xa9   :  { %v1328_v16 = vpop.eup %1327 }
  0xaa   :  { %v169_v17 = vadd.f32 1.0, %v1328_v16 }
  0xac   :  { %1329 = vrcp.f32 %v169_v17  ;;  %v181_v23 = vand.u32 2147483648, %v169_v17  ;;  %vm175_vm2 = vweird.f32 %v169_v17  ;;  %v179_v24 = vand.u32 2147483647, %v169_v17 }
  0xae   :  { %v182_v26 = vor.u32 1.1754944e-38, %v181_v23  ;;  %vm180_vm4 = vcmp.eq.f32.partialorder %v179_v24, 8.507059e+37 }
  0xb2   :  { %v1330_v18 = vpop.eup %1329 }
  0xb3   :  { %v171_v19 = vmul.f32 %v1330_v18, %v169_v17  ;;  %vm176_vm1 = vweird.f32 %v1330_v18 }
  0xb4   :  { %vm177_vm3 = vmor %vm175_vm2, %vm176_vm1 }
  0xb5   :  { %v172_v20 = vsub.f32 1.0, %v171_v19 }
  0xb7   :  { %v173_v21 = vmul.f32 %v1330_v18, %v172_v20 }
  0xb9   :  { %v174_v22 = vadd.f32 %v1330_v18, %v173_v21 }
  0xbb   :  { %v178_v25 = vsel %vm177_vm3, %v1330_v18, %v174_v22 }
  0xbc   :  { %v183_v28 = vsel %vm180_vm4, %v182_v26, %v178_v25 }
  0xbd   :  { %v186_v30 = vmul.f32 0.0, %v183_v28 }
 0x11a   :  { %v189_v27 = vpop.permute.xlu0 %188 }
 0x11b   :  { %v191_v29 = vmul.f32 %v189_v27, %v183_v28  ;;  %v341_v27 = vld [vmem:[#allocation3 + $0x6] sm:$0x3] }
 0x11d   :  { %193 = vrot.lane.b32.xlu0 %v191_v29, %s1589_s3 }
 0x18f   :  { %v194_v31 = vpop.permute.xlu0 %193 }
 0x190   :  { %v196_v32 = vadd.f32 %v194_v31, %v186_v30 }
 0x192   :  { %1331 = vtanh.f32 %v196_v32 }
 0x198   :  { %v1332_v33 = vpop.eup %1331 }
 0x199   :  { %199 = vrot.lane.b32.xlu1 %v1332_v33, %s1588_s15 }
 0x20b   :  { %v200_v34 = vpop.permute.xlu1 %199 }
 0x20c   :  { %v202_v35 = vmul.f32 %v200_v34, %v183_v28 }
 0x20e   :  { %204 = vrot.lane.b32.xlu1 %v202_v35, %s1589_s3 }
 0x280   :  { %v205_v36 = vpop.permute.xlu1 %204 }
 0x281   :  { %208 = vst.msk [vmem:[#allocation2] sm:$0x3] %vm207_vm5, %v205_v36  ;;  %1280 = vmatmul.msk.f32.vlgmr.msra.gmra.mxu2 %vm141_vm6, %v205_v36 }
 0x304   :  { %v229_v38 = vpop.f32.mrf.mxu2 }
 0x305   :  { %v232_v39 = vadd.f32 %v229_v38, %v209_v37 }
 0x307   :  { %1333 = vtanh.f32 %v232_v39  ;;  %v1281_v41 = vmul.f32 -1.442695, %v232_v39 }
 0x309   :  { %1335 = vpow2.f32 %v1281_v41 }
 0x30d   :  { %v1334_v40 = vpop.eup %1333 }
 0x30e   :  { %255 = vrot.lane.b32.xlu2 %v1334_v40, %s1588_s15 }
 0x30f   :  { %v1336_v42 = vpop.eup %1335 }
 0x310   :  { %v236_v43 = vadd.f32 1.0, %v1336_v42 }
 0x312   :  { %1337 = vrcp.f32 %v236_v43  ;;  %v248_v49 = vand.u32 2147483648, %v236_v43  ;;  %vm242_vm8 = vweird.f32 %v236_v43  ;;  %v246_v50 = vand.u32 2147483647, %v236_v43 }
 0x314   :  { %v249_v52 = vor.u32 1.1754944e-38, %v248_v49  ;;  %vm247_vm10 = vcmp.eq.f32.partialorder %v246_v50, 8.507059e+37  ;;  %v104_v50 = vld [vmem:[#allocation4 + $0x8] sm:$0xff] }
 0x315   :  { %1278 = vmatmul.msk.f32.gmra.mxu0 %vm108_vm0, %v104_v50 }
 0x318   :  { %v1338_v44 = vpop.eup %1337 }
 0x319   :  { %v238_v45 = vmul.f32 %v1338_v44, %v236_v43  ;;  %vm243_vm7 = vweird.f32 %v1338_v44 }
 0x31a   :  { %vm244_vm9 = vmor %vm242_vm8, %vm243_vm7 }
 0x31b   :  { %v239_v46 = vsub.f32 1.0, %v238_v45 }
 0x31d   :  { %v240_v47 = vmul.f32 %v1338_v44, %v239_v46 }
 0x31f   :  { %v241_v48 = vadd.f32 %v1338_v44, %v240_v47 }
 0x321   :  { %v245_v51 = vsel %vm244_vm9, %v1338_v44, %v241_v48 }
 0x322   :  { %v250_v54 = vsel %vm247_vm10, %v249_v52, %v245_v51 }
 0x323   :  { %v253_v56 = vmul.f32 %v250_v54, %v196_v32 }
 0x368   :  { %v256_v53 = vpop.permute.xlu2 %255 }
 0x369   :  { %v258_v55 = vmul.f32 %v256_v53, %v250_v54  ;;  %v674_v53 = vld [vmem:[#allocation9 + $0x18] sm:$0xff] }
 0x36a   :  { %703 = vmatpush.msra.mxu2 %v674_v53 }
 0x36b   :  { %260 = vrot.lane.b32.xlu2 %v258_v55, %s1589_s3  ;;  %v672_v55 = vld [vmem:[#allocation9 + $0x8] sm:$0xff] }
 0x3c5   :  { %v261_v57 = vpop.permute.xlu2 %260 }
 0x3c6   :  { %v263_v58 = vadd.f32 %v261_v57, %v253_v56  ;;  %v671_v56 = vld [vmem:[#allocation9] sm:$0xff]  ;;  %v135_v57 = vpop.f32.mrf.mxu0 }
 0x3c8   :  { %1339 = vtanh.f32 %v263_v58 }
 0x3ce   :  { %v1340_v59 = vpop.eup %1339 }
 0x3cf   :  { %266 = vrot.lane.b32.xlu0 %v1340_v59, %s1588_s15 }
 0x441   :  { %v267_v60 = vpop.permute.xlu0 %266 }
 0x442   :  { %v269_v61 = vmul.f32 %v267_v60, %v250_v54  ;;  %v673_v54 = vld [vmem:[#allocation9 + $0x10] sm:$0xff] }
 0x443   :  { %704 = vmatpush.msra.mxu2 %v673_v54 }
 0x444   :  { %271 = vrot.lane.b32.xlu1 %v269_v61, %s1589_s3 }
 0x445   :  { %705 = vmatpush.msra.mxu2 %v672_v55 }
 0x447   :  { %706 = vmatpush.msra.mxu2 %v671_v56 }
 0x4b6   :  { %v272_v62 = vpop.permute.xlu1 %271 }
 0x4b7   :  { %274 = vst.msk [vmem:[#allocation2 + $0x2] sm:$0x3] %vm207_vm5, %v272_v62  ;;  %1282 = vmatmul.msk.f32.vlgmr.msra.gmra.mxu3 %vm141_vm6, %v272_v62 }
 0x53a   :  { %v295_v0 = vpop.f32.mrf.mxu3 }
 0x53b   :  { %v298_v1 = vadd.f32 %v295_v0, %v275_v63  ;;  %v1703_v0 = vld [vmem:[%s1856_s6] ss:$0 sm:$0xff] }
 0x53d   :  { %1341 = vtanh.f32 %v298_v1  ;;  %v1283_v3 = vmul.f32 -1.442695, %v298_v1 }
 0x53f   :  { %1343 = vpow2.f32 %v1283_v3 }
 0x543   :  { %v1342_v2 = vpop.eup %1341 }
 0x544   :  { %321 = vrot.lane.b32.xlu2 %v1342_v2, %s1588_s15 }
 0x545   :  { %v1344_v4 = vpop.eup %1343 }
 0x546   :  { %v302_v5 = vadd.f32 1.0, %v1344_v4 }
 0x548   :  { %1345 = vrcp.f32 %v302_v5  ;;  %v314_v13 = vand.u32 2147483648, %v302_v5  ;;  %vm308_vm12 = vweird.f32 %v302_v5  ;;  %v312_v14 = vand.u32 2147483647, %v302_v5 }
 0x54a   :  { %v315_v16 = vor.u32 1.1754944e-38, %v314_v13  ;;  %vm313_vm14 = vcmp.eq.f32.partialorder %v312_v14, 8.507059e+37 }
 0x54e   :  { %v1346_v6 = vpop.eup %1345 }
 0x54f   :  { %v304_v9 = vmul.f32 %v1346_v6, %v302_v5  ;;  %vm309_vm11 = vweird.f32 %v1346_v6 }
 0x550   :  { %vm310_vm13 = vmor %vm308_vm12, %vm309_vm11 }
 0x551   :  { %v305_v10 = vsub.f32 1.0, %v304_v9 }
 0x553   :  { %v306_v11 = vmul.f32 %v1346_v6, %v305_v10 }
 0x555   :  { %v307_v12 = vadd.f32 %v1346_v6, %v306_v11 }
 0x557   :  { %v311_v15 = vsel %vm310_vm13, %v1346_v6, %v307_v12 }
 0x558   :  { %v316_v18 = vsel %vm313_vm14, %v315_v16, %v311_v15 }
 0x559   :  { %v319_v20 = vmul.f32 %v316_v18, %v263_v58  ;;  %v136_v58 = vadd.f32 %v1670_v8, %v135_v57 }
 0x55b   :  { %139 = vst [vmem:[#allocation3 + $0x8] sm:$0xff] %v136_v58 }
 0x562   :  { %v407_v61 = vld [vmem:[#allocation3 + $0x8] sm:$0x3] }
 0x59e   :  { %v322_v17 = vpop.permute.xlu2 %321 }
 0x59f   :  { %v324_v19 = vmul.f32 %v322_v17, %v316_v18 }
 0x5a1   :  { %326 = vrot.lane.b32.xlu0 %v324_v19, %s1589_s3 }
 0x613   :  { %v327_v21 = vpop.permute.xlu0 %326 }
 0x614   :  { %v329_v22 = vadd.f32 %v327_v21, %v319_v20 }
 0x616   :  { %1347 = vtanh.f32 %v329_v22 }
 0x61c   :  { %v1348_v23 = vpop.eup %1347 }
 0x61d   :  { %332 = vrot.lane.b32.xlu1 %v1348_v23, %s1588_s15 }
 0x68f   :  { %v333_v24 = vpop.permute.xlu1 %332 }
 0x690   :  { %v335_v25 = vmul.f32 %v333_v24, %v316_v18 }
 0x692   :  { %337 = vrot.lane.b32.xlu2 %v335_v25, %s1589_s3 }
 0x6ec   :  { %v338_v26 = vpop.permute.xlu2 %337 }
 0x6ed   :  { %340 = vst.msk [vmem:[#allocation2 + $0x4] sm:$0x3] %vm207_vm5, %v338_v26  ;;  %1284 = vmatmul.msk.f32.vlgmr.msrb.gmra.mxu1 %vm141_vm6, %v338_v26  ;;  %v1713_v26 = vld [vmem:[#allocation10 + $0x18] sm:$0xff] }
 0x6ee   :  { %729 = vmatpush.msra.mxu3 %v1713_v26  ;;  %793 = vmatpush.msra.mxu0 %v1713_v26 }
 0x6ef   :  { %857 = vmatpush.msrb.mxu1 %v1713_v26 }
 0x76a   :  { %v361_v28 = vpop.f32.mrf.mxu1 }
 0x76b   :  { %v364_v29 = vadd.f32 %v361_v28, %v341_v27  ;;  %v1715_v27 = vld [vmem:[#allocation10 + $0x10] sm:$0xff]  ;;  %v1719_v28 = vld [vmem:[#allocation10 + $0x8] sm:$0xff] }
 0x76c   :  { %730 = vmatpush.msra.mxu3 %v1715_v27  ;;  %794 = vmatpush.msra.mxu0 %v1715_v27 }
 0x76d   :  { %1349 = vtanh.f32 %v364_v29  ;;  %v1285_v31 = vmul.f32 -1.442695, %v364_v29  ;;  %v1725_v29 = vld [vmem:[#allocation10] sm:$0xff]  ;;  %858 = vmatpush.msrb.mxu1 %v1715_v27 }
 0x76e   :  { %731 = vmatpush.msra.mxu3 %v1719_v28  ;;  %795 = vmatpush.msra.mxu0 %v1719_v28 }
 0x76f   :  { %1351 = vpow2.f32 %v1285_v31  ;;  %859 = vmatpush.msrb.mxu1 %v1719_v28  ;;  %v473_v31 = vld [vmem:[#allocation3 + $0xa] sm:$0x3] }
 0x770   :  { %732 = vmatpush.msra.mxu3 %v1725_v29  ;;  %796 = vmatpush.msra.mxu0 %v1725_v29 }
 0x771   :  { %860 = vmatpush.msrb.mxu1 %v1725_v29 }
 0x773   :  { %v1350_v30 = vpop.eup %1349 }
 0x774   :  { %387 = vrot.lane.b32.xlu0 %v1350_v30, %s1588_s15 }
 0x775   :  { %v1352_v32 = vpop.eup %1351 }
 0x776   :  { %v368_v33 = vadd.f32 1.0, %v1352_v32 }
 0x778   :  { %1353 = vrcp.f32 %v368_v33  ;;  %v380_v39 = vand.u32 2147483648, %v368_v33  ;;  %vm374_vm1 = vweird.f32 %v368_v33  ;;  %v378_v40 = vand.u32 2147483647, %v368_v33 }
 0x77a   :  { %v381_v42 = vor.u32 1.1754944e-38, %v380_v39  ;;  %vm379_vm3 = vcmp.eq.f32.partialorder %v378_v40, 8.507059e+37 }
 0x77e   :  { %v1354_v34 = vpop.eup %1353 }
 0x77f   :  { %v370_v35 = vmul.f32 %v1354_v34, %v368_v33  ;;  %vm375_vm15 = vweird.f32 %v1354_v34 }
 0x780   :  { %vm376_vm2 = vmor %vm374_vm1, %vm375_vm15 }
 0x781   :  { %v371_v36 = vsub.f32 1.0, %v370_v35 }
 0x783   :  { %v372_v37 = vmul.f32 %v1354_v34, %v371_v36 }
 0x785   :  { %v373_v38 = vadd.f32 %v1354_v34, %v372_v37 }
 0x787   :  { %v377_v41 = vsel %vm376_vm2, %v1354_v34, %v373_v38 }
 0x788   :  { %v382_v44 = vsel %vm379_vm3, %v381_v42, %v377_v41 }
 0x789   :  { %v385_v46 = vmul.f32 %v382_v44, %v329_v22 }
 0x7e6   :  { %v388_v43 = vpop.permute.xlu0 %387 }
 0x7e7   :  { %v390_v45 = vmul.f32 %v388_v43, %v382_v44 }
 0x7e9   :  { %392 = vrot.lane.b32.xlu1 %v390_v45, %s1589_s3 }
 0x85b   :  { %v393_v47 = vpop.permute.xlu1 %392 }
 0x85c   :  { %v395_v48 = vadd.f32 %v393_v47, %v385_v46 }
 0x85e   :  { %1355 = vtanh.f32 %v395_v48 }
 0x864   :  { %v1356_v49 = vpop.eup %1355 }
 0x865   :  { %398 = vrot.lane.b32.xlu2 %v1356_v49, %s1588_s15 }
 0x8bf   :  { %v399_v51 = vpop.permute.xlu2 %398 }
 0x8c0   :  { %v401_v52 = vmul.f32 %v399_v51, %v382_v44 }
 0x8c2   :  { %403 = vrot.lane.b32.xlu0 %v401_v52, %s1589_s3 }
 0x934   :  { %v404_v59 = vpop.permute.xlu0 %403 }
 0x935   :  { %406 = vst.msk [vmem:[#allocation2 + $0x6] sm:$0x3] %vm207_vm5, %v404_v59  ;;  %1286 = vmatmul.msk.f32.vlgmr.msrb.gmra.mxu2 %vm141_vm6, %v404_v59 }
 0x936   :  { %1113 = vmatpush.msrb.mxu2 %v1713_v26 }
 0x938   :  { %1114 = vmatpush.msrb.mxu2 %v1715_v27 }
 0x93a   :  { %1115 = vmatpush.msrb.mxu2 %v1719_v28 }
 0x93c   :  { %v680_v60 = vld [vmem:[#allocation2] sm:$0xff]  ;;  %1116 = vmatpush.msrb.mxu2 %v1725_v29 }
 0x93d   :  { %1294 = vmatmul.msk.f32.vlgmr.msra.gmra.mxu2 %vm141_vm6, %v680_v60 }
 0x9b8   :  { %v427_v62 = vpop.f32.mrf.mxu2 }
 0x9b9   :  { %v430_v63 = vadd.f32 %v427_v62, %v407_v61 }
 0x9bb   :  { %1357 = vtanh.f32 %v430_v63  ;;  %v1287_v3 = vmul.f32 -1.442695, %v430_v63 }
 0x9bd   :  { %1359 = vpow2.f32 %v1287_v3 }
 0x9c0   :  { %v708_v1 = vpop.f32.mrf.mxu2 }
 0x9c1   :  { %v1358_v8 = vpop.eup %1357  ;;  %v709_v2 = vadd.f32 %v1703_v0, %v708_v1 }
 0x9c2   :  { %453 = vrot.lane.b32.xlu1 %v1358_v8, %s1588_s15 }
 0x9c3   :  { %714 = vst [vmem:[#allocation3] sm:$0xff] %v709_v2  ;;  %v1360_v4 = vpop.eup %1359 }
 0x9c4   :  { %v434_v5 = vadd.f32 1.0, %v1360_v4 }
 0x9c6   :  { %1361 = vrcp.f32 %v434_v5  ;;  %v446_v13 = vand.u32 2147483648, %v434_v5  ;;  %vm440_vm4 = vweird.f32 %v434_v5  ;;  %v444_v14 = vand.u32 2147483647, %v434_v5 }
 0x9c8   :  { %v447_v16 = vor.u32 1.1754944e-38, %v446_v13  ;;  %vm445_vm8 = vcmp.eq.f32.partialorder %v444_v14, 8.507059e+37 }
 0x9ca   :  { %v716_v34 = vld [vmem:[#allocation3] sm:$0x3] }
 0x9cc   :  { %v1362_v6 = vpop.eup %1361 }
 0x9cd   :  { %v436_v9 = vmul.f32 %v1362_v6, %v434_v5  ;;  %vm441_vm0 = vweird.f32 %v1362_v6 }
 0x9ce   :  { %vm442_vm7 = vmor %vm440_vm4, %vm441_vm0 }
 0x9cf   :  { %v437_v10 = vsub.f32 1.0, %v436_v9 }
 0x9d1   :  { %v438_v11 = vmul.f32 %v1362_v6, %v437_v10 }
 0x9d3   :  { %v439_v12 = vadd.f32 %v1362_v6, %v438_v11 }
 0x9d5   :  { %v443_v15 = vsel %vm442_vm7, %v1362_v6, %v439_v12 }
 0x9d6   :  { %v448_v18 = vsel %vm445_vm8, %v447_v16, %v443_v15 }
 0x9d7   :  { %v451_v20 = vmul.f32 %v448_v18, %v395_v48 }
 0xa34   :  { %v454_v17 = vpop.permute.xlu1 %453 }
 0xa35   :  { %v456_v19 = vmul.f32 %v454_v17, %v448_v18 }
 0xa37   :  { %458 = vrot.lane.b32.xlu2 %v456_v19, %s1589_s3 }
 0xa91   :  { %v459_v21 = vpop.permute.xlu2 %458 }
 0xa92   :  { %v1708_v22 = vadd.f32 %v459_v21, %v451_v20  ;;  %v539_v20 = vld [vmem:[#allocation3 + $0xc] sm:$0x3] }
 0xa94   :  { %1363 = vtanh.f32 %v1708_v22 }
 0xa9a   :  { %v1364_v23 = vpop.eup %1363 }
 0xa9b   :  { %464 = vrot.lane.b32.xlu0 %v1364_v23, %s1588_s15 }
 0xb0d   :  { %v465_v24 = vpop.permute.xlu0 %464 }
 0xb0e   :  { %v467_v25 = vmul.f32 %v465_v24, %v448_v18  ;;  %v775_v24 = vld [vmem:[#allocation3 + $0x2] sm:$0x3] }
 0xb10   :  { %469 = vrot.lane.b32.xlu1 %v467_v25, %s1589_s3 }
 0xb82   :  { %v470_v30 = vpop.permute.xlu1 %469 }
 0xb83   :  { %472 = vst.msk [vmem:[#allocation2 + $0x8] sm:$0x3] %vm207_vm5, %v470_v30  ;;  %1288 = vmatmul.msk.f32.vlgmr.msrb.gmra.mxu3 %vm141_vm6, %v470_v30 }
 0xb84   :  { %921 = vmatpush.msrb.mxu3 %v1713_v26 }
 0xb86   :  { %922 = vmatpush.msrb.mxu3 %v1715_v27 }
 0xb88   :  { %923 = vmatpush.msrb.mxu3 %v1719_v28 }
 0xb8a   :  { %924 = vmatpush.msrb.mxu3 %v1725_v29 }
 0xb8b   :  { %733 = vmatmul.f32.vlgmr.msra.gmra.mxu3 %v1587_v7 }
 0xb8c   :  { %1177 = vmatpush.msra.mxu3 %v1713_v26 }
 0xb8e   :  { %1178 = vmatpush.msra.mxu3 %v1715_v27 }
 0xb90   :  { %1179 = vmatpush.msra.mxu3 %v1719_v28 }
 0xb92   :  { %1180 = vmatpush.msra.mxu3 %v1725_v29 }
 0xc06   :  { %v493_v32 = vpop.f32.mrf.mxu3 }
 0xc07   :  { %v496_v33 = vadd.f32 %v493_v32, %v473_v31 }
 0xc09   :  { %1365 = vtanh.f32 %v496_v33  ;;  %v1289_v38 = vmul.f32 -1.442695, %v496_v33 }
 0xc0e   :  { %v734_v35 = vpop.f32.mrf.mxu3 }
 0xc0f   :  { %v1366_v36 = vpop.eup %1365  ;;  %v737_v37 = vadd.f32 %v734_v35, %v716_v34 }
 0xc10   :  { %519 = vrot.lane.b32.xlu2 %v1366_v36, %s1588_s15 }
 0xc11   :  { %1367 = vtanh.f32 %v737_v37  ;;  %v1296_v44 = vmul.f32 -1.442695, %v737_v37 }
 0xc12   :  { %1369 = vpow2.f32 %v1289_v38 }
 0xc17   :  { %v1368_v7 = vpop.eup %1367 }
 0xc18   :  { %760 = vrot.lane.b32.xlu0 %v1368_v7, %s1588_s15  ;;  %v1370_v39 = vpop.eup %1369 }
 0xc19   :  { %v500_v40 = vadd.f32 1.0, %v1370_v39 }
 0xc1b   :  { %1371 = vrcp.f32 %v500_v40  ;;  %v512_v47 = vand.u32 2147483648, %v500_v40  ;;  %vm506_vm10 = vweird.f32 %v500_v40  ;;  %v510_v48 = vand.u32 2147483647, %v500_v40 }
 0xc1c   :  { %1373 = vpow2.f32 %v1296_v44 }
 0xc1d   :  { %v513_v51 = vor.u32 1.1754944e-38, %v512_v47  ;;  %vm511_vm12 = vcmp.eq.f32.partialorder %v510_v48, 8.507059e+37 }
 0xc21   :  { %v1372_v41 = vpop.eup %1371 }
 0xc22   :  { %v502_v42 = vmul.f32 %v1372_v41, %v500_v40  ;;  %vm507_vm9 = vweird.f32 %v1372_v41  ;;  %v1374_v49 = vpop.eup %1373 }
 0xc23   :  { %vm508_vm11 = vmor %vm506_vm10, %vm507_vm9  ;;  %v741_v52 = vadd.f32 1.0, %v1374_v49 }
 0xc24   :  { %v503_v43 = vsub.f32 1.0, %v502_v42 }
 0xc25   :  { %1375 = vrcp.f32 %v741_v52  ;;  %v753_v61 = vand.u32 2147483648, %v741_v52  ;;  %vm747_vm14 = vweird.f32 %v741_v52  ;;  %v751_v62 = vand.u32 2147483647, %v741_v52 }
 0xc26   :  { %v504_v45 = vmul.f32 %v1372_v41, %v503_v43 }
 0xc27   :  { %v754_v1 = vor.u32 1.1754944e-38, %v753_v61  ;;  %vm752_vm1 = vcmp.eq.f32.partialorder %v751_v62, 8.507059e+37 }
 0xc28   :  { %v505_v46 = vadd.f32 %v1372_v41, %v504_v45 }
 0xc2a   :  { %v509_v50 = vsel %vm508_vm11, %v1372_v41, %v505_v46 }
 0xc2b   :  { %v514_v54 = vsel %vm511_vm12, %v513_v51, %v509_v50  ;;  %v1376_v56 = vpop.eup %1375 }
 0xc2c   :  { %v743_v57 = vmul.f32 %v1376_v56, %v741_v52  ;;  %vm748_vm13 = vweird.f32 %v1376_v56  ;;  %v517_v4 = vmul.f32 %v514_v54, %v1708_v22 }
 0xc2d   :  { %vm749_vm15 = vmor %vm747_vm14, %vm748_vm13 }
 0xc2e   :  { %v744_v58 = vsub.f32 1.0, %v743_v57 }
 0xc30   :  { %v745_v59 = vmul.f32 %v1376_v56, %v744_v58 }
 0xc32   :  { %v746_v60 = vadd.f32 %v1376_v56, %v745_v59 }
 0xc34   :  { %v750_v63 = vsel %vm749_vm15, %v1376_v56, %v746_v60 }
 0xc35   :  { %v755_v2 = vsel %vm752_vm1, %v754_v1, %v750_v63 }
 0xc36   :  { %v758_v9 = vmul.f32 0.0, %v755_v2 }
 0xc6a   :  { %v520_v53 = vpop.permute.xlu2 %519 }
 0xc6b   :  { %v522_v55 = vmul.f32 %v520_v53, %v514_v54 }
 0xc6d   :  { %524 = vrot.lane.b32.xlu1 %v522_v55, %s1589_s3 }
 0xc8a   :  { %v761_v8 = vpop.permute.xlu0 %760 }
 0xc8b   :  { %v763_v3 = vmul.f32 %v761_v8, %v755_v2 }
 0xc8d   :  { %765 = vrot.lane.b32.xlu2 %v763_v3, %s1589_s3 }
 0xcdf   :  { %v525_v5 = vpop.permute.xlu1 %524 }
 0xce0   :  { %v1753_v6 = vadd.f32 %v525_v5, %v517_v4 }
 0xce2   :  { %1377 = vtanh.f32 %v1753_v6 }
 0xce7   :  { %v766_v10 = vpop.permute.xlu2 %765 }
 0xce8   :  { %v1378_v11 = vpop.eup %1377  ;;  %v1756_v12 = vadd.f32 %v766_v10, %v758_v9 }
 0xce9   :  { %530 = vrot.lane.b32.xlu0 %v1378_v11, %s1588_s15 }
 0xcea   :  { %1379 = vtanh.f32 %v1756_v12 }
 0xcf0   :  { %v1380_v13 = vpop.eup %1379 }
 0xcf1   :  { %771 = vrot.lane.b32.xlu1 %v1380_v13, %s1588_s15 }
 0xd5b   :  { %v531_v14 = vpop.permute.xlu0 %530 }
 0xd5c   :  { %v533_v15 = vmul.f32 %v531_v14, %v514_v54  ;;  %v839_v14 = vld [vmem:[#allocation3 + $0x4] sm:$0x3] }
 0xd5e   :  { %535 = vrot.lane.b32.xlu2 %v533_v15, %s1589_s3 }
 0xd63   :  { %v772_v16 = vpop.permute.xlu1 %771 }
 0xd64   :  { %v774_v17 = vmul.f32 %v772_v16, %v755_v2 }
 0xd66   :  { %777 = vrot.lane.b32.xlu0 %v774_v17, %s1589_s3 }
 0xdb8   :  { %v536_v18 = vpop.permute.xlu2 %535 }
 0xdb9   :  { %538 = vst.msk [vmem:[#allocation2 + $0xa] sm:$0x3] %vm207_vm5, %v536_v18  ;;  %1290 = vmatmul.msk.f32.vlgmr.msrb.gmra.mxu0 %vm141_vm6, %v536_v18 }
 0xdba   :  { %985 = vmatpush.msrb.mxu0 %v1713_v26 }
 0xdbc   :  { %986 = vmatpush.msrb.mxu0 %v1715_v27 }
 0xdbe   :  { %987 = vmatpush.msrb.mxu0 %v1719_v28 }
 0xdc0   :  { %988 = vmatpush.msrb.mxu0 %v1725_v29 }
 0xdd8   :  { %v778_v19 = vpop.permute.xlu0 %777 }
 0xdd9   :  { %1297 = vmatmul.msk.f32.vlgmr.msra.gmra.mxu0 %vm141_vm6, %v778_v19 }
 0xe36   :  { %v559_v21 = vpop.f32.mrf.mxu0 }
 0xe37   :  { %v562_v22 = vadd.f32 %v559_v21, %v539_v20 }
 0xe39   :  { %1381 = vtanh.f32 %v562_v22  ;;  %v1291_v32 = vmul.f32 -1.442695, %v562_v22 }
 0xe3f   :  { %v1382_v23 = vpop.eup %1381 }
 0xe40   :  { %585 = vrot.lane.b32.xlu1 %v1382_v23, %s1588_s15 }
 0xe56   :  { %v798_v25 = vpop.f32.mrf.mxu0 }
 0xe57   :  { %v801_v30 = vadd.f32 %v798_v25, %v775_v24 }
 0xe59   :  { %1383 = vtanh.f32 %v801_v30  ;;  %v1298_v33 = vmul.f32 -1.442695, %v801_v30  ;;  %v605_v30 = vld [vmem:[#allocation3 + $0xe] sm:$0x3] }
 0xe5a   :  { %1385 = vpow2.f32 %v1291_v32 }
 0xe5b   :  { %1387 = vpow2.f32 %v1298_v33 }
 0xe5f   :  { %v1384_v31 = vpop.eup %1383 }
 0xe60   :  { %824 = vrot.lane.b32.xlu2 %v1384_v31, %s1588_s15  ;;  %v1386_v34 = vpop.eup %1385 }
 0xe61   :  { %v566_v35 = vadd.f32 1.0, %v1386_v34  ;;  %v1388_v36 = vpop.eup %1387 }
 0xe62   :  { %v805_v37 = vadd.f32 1.0, %v1388_v36 }
 0xe63   :  { %1389 = vrcp.f32 %v566_v35  ;;  %v578_v45 = vand.u32 2147483648, %v566_v35  ;;  %vm572_vm3 = vweird.f32 %v566_v35  ;;  %v576_v46 = vand.u32 2147483647, %v566_v35 }
 0xe64   :  { %1391 = vrcp.f32 %v805_v37  ;;  %v817_v54 = vand.u32 2147483648, %v805_v37  ;;  %vm811_vm8 = vweird.f32 %v805_v37  ;;  %v815_v55 = vand.u32 2147483647, %v805_v37 }
 0xe65   :  { %v579_v49 = vor.u32 1.1754944e-38, %v578_v45  ;;  %vm577_vm4 = vcmp.eq.f32.partialorder %v576_v46, 8.507059e+37 }
 0xe66   :  { %v818_v57 = vor.u32 1.1754944e-38, %v817_v54  ;;  %vm816_vm10 = vcmp.eq.f32.partialorder %v815_v55, 8.507059e+37 }
 0xe69   :  { %v1390_v7 = vpop.eup %1389 }
 0xe6a   :  { %v568_v38 = vmul.f32 %v1390_v7, %v566_v35  ;;  %v1392_v40 = vpop.eup %1391  ;;  %vm573_vm2 = vweird.f32 %v1390_v7 }
 0xe6b   :  { %v807_v42 = vmul.f32 %v1392_v40, %v805_v37  ;;  %vm574_vm0 = vmor %vm572_vm3, %vm573_vm2  ;;  %vm812_vm7 = vweird.f32 %v1392_v40 }
 0xe6c   :  { %v569_v39 = vsub.f32 1.0, %v568_v38  ;;  %vm813_vm9 = vmor %vm811_vm8, %vm812_vm7 }
 0xe6d   :  { %v808_v44 = vsub.f32 1.0, %v807_v42 }
 0xe6e   :  { %v570_v41 = vmul.f32 %v1390_v7, %v569_v39 }
 0xe6f   :  { %v809_v48 = vmul.f32 %v1392_v40, %v808_v44 }
 0xe70   :  { %v571_v43 = vadd.f32 %v1390_v7, %v570_v41 }
 0xe71   :  { %v810_v53 = vadd.f32 %v1392_v40, %v809_v48 }
 0xe72   :  { %v575_v47 = vsel %vm574_vm0, %v1390_v7, %v571_v43 }
 0xe73   :  { %v580_v50 = vsel %vm577_vm4, %v579_v49, %v575_v47  ;;  %v814_v56 = vsel %vm813_vm9, %v1392_v40, %v810_v53 }
 0xe74   :  { %v819_v59 = vsel %vm816_vm10, %v818_v57, %v814_v56  ;;  %v583_v61 = vmul.f32 %v580_v50, %v1753_v6  ;;  %v903_v57 = vld [vmem:[#allocation3 + $0x6] sm:$0x3] }
 0xe75   :  { %v822_v1 = vmul.f32 %v819_v59, %v1756_v12 }
 0xeb2   :  { %v586_v51 = vpop.permute.xlu1 %585 }
 0xeb3   :  { %v588_v52 = vmul.f32 %v586_v51, %v580_v50 }
 0xeb5   :  { %590 = vrot.lane.b32.xlu0 %v588_v52, %s1589_s3 }
 0xeba   :  { %v825_v58 = vpop.permute.xlu2 %824 }
 0xebb   :  { %v827_v60 = vmul.f32 %v825_v58, %v819_v59 }
 0xebd   :  { %829 = vrot.lane.b32.xlu1 %v827_v60, %s1589_s3 }
 0xf27   :  { %v591_v62 = vpop.permute.xlu0 %590 }
 0xf28   :  { %v1775_v63 = vadd.f32 %v591_v62, %v583_v61 }
 0xf2a   :  { %1393 = vtanh.f32 %v1775_v63 }
 0xf2f   :  { %v830_v8 = vpop.permute.xlu1 %829 }
 0xf30   :  { %v1394_v2 = vpop.eup %1393  ;;  %v832_v3 = vadd.f32 %v830_v8, %v822_v1 }
 0xf31   :  { %596 = vrot.lane.b32.xlu2 %v1394_v2, %s1588_s15 }
 0xf32   :  { %1395 = vtanh.f32 %v832_v3 }
 0xf38   :  { %v1396_v4 = vpop.eup %1395 }
 0xf39   :  { %835 = vrot.lane.b32.xlu0 %v1396_v4, %s1588_s15 }
 0xf8b   :  { %v597_v5 = vpop.permute.xlu2 %596 }
 0xf8c   :  { %v599_v9 = vmul.f32 %v597_v5, %v580_v50 }
 0xf8e   :  { %601 = vrot.lane.b32.xlu1 %v599_v9, %s1589_s3 }
 0xfab   :  { %v836_v6 = vpop.permute.xlu0 %835 }
 0xfac   :  { %v838_v10 = vmul.f32 %v836_v6, %v819_v59 }
 0xfae   :  { %841 = vrot.lane.b32.xlu2 %v838_v10, %s1589_s3 }
0x1000   :  { %v602_v11 = vpop.permute.xlu1 %601 }
0x1001   :  { %604 = vst.msk [vmem:[#allocation2 + $0xc] sm:$0x3] %vm207_vm5, %v602_v11  ;;  %1292 = vmatmul.msk.f32.vlgmr.msra.gmra.mxu1 %vm141_vm6, %v602_v11 }
0x1002   :  { %1049 = vmatpush.msra.mxu1 %v1713_v26 }
0x1004   :  { %1050 = vmatpush.msra.mxu1 %v1715_v27 }
0x1006   :  { %1051 = vmatpush.msra.mxu1 %v1719_v28 }
0x1008   :  { %v842_v12 = vpop.permute.xlu2 %841  ;;  %1052 = vmatpush.msra.mxu1 %v1725_v29 }
0x1009   :  { %1299 = vmatmul.msk.f32.vlgmr.msrb.gmra.mxu1 %vm141_vm6, %v842_v12 }
0x107e   :  { %v625_v13 = vpop.f32.mrf.mxu1 }
0x107f   :  { %v628_v31 = vadd.f32 %v625_v13, %v605_v30 }
0x1081   :  { %v1293_v39 = vmul.f32 -1.442695, %v628_v31 }
0x1086   :  { %v862_v15 = vpop.f32.mrf.mxu1 }
0x1087   :  { %v865_v16 = vadd.f32 %v862_v15, %v839_v14 }
0x1089   :  { %1397 = vtanh.f32 %v865_v16  ;;  %v1300_v18 = vmul.f32 -1.442695, %v865_v16 }
0x108b   :  { %1399 = vpow2.f32 %v1300_v18 }
0x108f   :  { %v1398_v17 = vpop.eup %1397 }
0x1090   :  { %888 = vrot.lane.b32.xlu0 %v1398_v17, %s1588_s15 }
0x1091   :  { %v1400_v26 = vpop.eup %1399 }
0x1092   :  { %v869_v19 = vadd.f32 1.0, %v1400_v26 }
0x1094   :  { %1401 = vrcp.f32 %v869_v19  ;;  %v881_v22 = vand.u32 2147483648, %v869_v19  ;;  %vm875_vm12 = vweird.f32 %v869_v19  ;;  %v879_v23 = vand.u32 2147483647, %v869_v19 }
0x1095   :  { %1403 = vtanh.f32 %v628_v31 }
0x1096   :  { %v882_v25 = vor.u32 1.1754944e-38, %v881_v22  ;;  %vm880_vm14 = vcmp.eq.f32.partialorder %v879_v23, 8.507059e+37 }
0x109a   :  { %v1402_v27 = vpop.eup %1401 }
0x109b   :  { %v871_v28 = vmul.f32 %v1402_v27, %v869_v19  ;;  %vm876_vm11 = vweird.f32 %v1402_v27  ;;  %v1404_v35 = vpop.eup %1403 }
0x109c   :  { %vm877_vm13 = vmor %vm875_vm12, %vm876_vm11 }
0x109d   :  { %v872_v20 = vsub.f32 1.0, %v871_v28 }
0x109f   :  { %v873_v21 = vmul.f32 %v1402_v27, %v872_v20 }
0x10a1   :  { %v874_v29 = vadd.f32 %v1402_v27, %v873_v21 }
0x10a3   :  { %v878_v24 = vsel %vm877_vm13, %v1402_v27, %v874_v29 }
0x10a4   :  { %v883_v33 = vsel %vm880_vm14, %v882_v25, %v878_v24 }
0x10a5   :  { %v886_v36 = vmul.f32 %v883_v33, %v832_v3 }
0x1102   :  { %v889_v32 = vpop.permute.xlu0 %888 }
0x1103   :  { %v891_v34 = vmul.f32 %v889_v32, %v883_v33 }
0x1105   :  { %893 = vrot.lane.b32.xlu1 %v891_v34, %s1589_s3 }
0x110d   :  { %651 = vrot.lane.b32.xlu1 %v1404_v35, %s1588_s15 }
0x1177   :  { %v894_v37 = vpop.permute.xlu1 %893 }
0x1178   :  { %v1793_v7 = vadd.f32 %v894_v37, %v886_v36 }
0x117a   :  { %1405 = vtanh.f32 %v1793_v7 }
0x117b   :  { %1407 = vpow2.f32 %v1293_v39 }
0x117f   :  { %v652_v52 = vpop.permute.xlu1 %651 }
0x1180   :  { %v1406_v38 = vpop.eup %1405 }
0x1181   :  { %899 = vrot.lane.b32.xlu2 %v1406_v38, %s1588_s15  ;;  %v1408_v40 = vpop.eup %1407 }
0x1182   :  { %v632_v41 = vadd.f32 1.0, %v1408_v40 }
0x1184   :  { %1409 = vrcp.f32 %v632_v41  ;;  %v644_v49 = vand.u32 2147483648, %v632_v41  ;;  %vm638_vm1 = vweird.f32 %v632_v41  ;;  %v642_v50 = vand.u32 2147483647, %v632_v41 }
0x1186   :  { %v645_v53 = vor.u32 1.1754944e-38, %v644_v49  ;;  %vm643_vm3 = vcmp.eq.f32.partialorder %v642_v50, 8.507059e+37 }
0x118a   :  { %v1410_v42 = vpop.eup %1409 }
0x118b   :  { %v634_v43 = vmul.f32 %v1410_v42, %v632_v41  ;;  %vm639_vm15 = vweird.f32 %v1410_v42 }
0x118c   :  { %vm640_vm2 = vmor %vm638_vm1, %vm639_vm15 }
0x118d   :  { %v635_v44 = vsub.f32 1.0, %v634_v43 }
0x118f   :  { %v636_v45 = vmul.f32 %v1410_v42, %v635_v44 }
0x1191   :  { %v637_v47 = vadd.f32 %v1410_v42, %v636_v45 }
0x1193   :  { %v641_v51 = vsel %vm640_vm2, %v1410_v42, %v637_v47 }
0x1194   :  { %v646_v54 = vsel %vm643_vm3, %v645_v53, %v641_v51 }
0x1195   :  { %v654_v55 = vmul.f32 %v652_v52, %v646_v54  ;;  %v649_v61 = vmul.f32 %v646_v54, %v1775_v63 }
0x11db   :  { %v900_v46 = vpop.permute.xlu2 %899 }
0x11dc   :  { %v902_v48 = vmul.f32 %v900_v46, %v883_v33 }
0x11de   :  { %905 = vrot.lane.b32.xlu0 %v902_v48, %s1589_s3 }
0x11e6   :  { %656 = vrot.lane.b32.xlu0 %v654_v55, %s1589_s3 }
0x1250   :  { %v906_v56 = vpop.permute.xlu0 %905 }
0x1251   :  { %1301 = vmatmul.msk.f32.vlgmr.msrb.gmra.mxu3 %vm141_vm6, %v906_v56 }
0x1258   :  { %v657_v60 = vpop.permute.xlu0 %656 }
0x1259   :  { %v659_v62 = vadd.f32 %v657_v60, %v649_v61 }
0x12d4   :  { %v926_v58 = vpop.f32.mrf.mxu3 }
0x12d5   :  { %v929_v59 = vadd.f32 %v926_v58, %v903_v57 }
0x12d7   :  { %1411 = vtanh.f32 %v929_v59  ;;  %v1302_v2 = vmul.f32 -1.442695, %v929_v59 }
0x12d8   :  { %1413 = vtanh.f32 %v659_v62 }
0x12d9   :  { %1415 = vpow2.f32 %v1302_v2 }
0x12dd   :  { %v1412_v1 = vpop.eup %1411 }
0x12de   :  { %952 = vrot.lane.b32.xlu2 %v1412_v1, %s1588_s15  ;;  %v1414_v8 = vpop.eup %1413 }
0x12df   :  { %v1416_v3 = vpop.eup %1415 }
0x12e0   :  { %v933_v4 = vadd.f32 1.0, %v1416_v3 }
0x12e2   :  { %1417 = vrcp.f32 %v933_v4  ;;  %v945_v63 = vand.u32 2147483648, %v933_v4  ;;  %vm939_vm4 = vweird.f32 %v933_v4  ;;  %v943_v12 = vand.u32 2147483647, %v933_v4 }
0x12e4   :  { %v946_v14 = vor.u32 1.1754944e-38, %v945_v63  ;;  %vm944_vm8 = vcmp.eq.f32.partialorder %v943_v12, 8.507059e+37 }
0x12e6   :  { %662 = vrot.lane.b32.xlu2 %v1414_v8, %s1588_s15 }
0x12e8   :  { %v1418_v5 = vpop.eup %1417 }
0x12e9   :  { %v935_v9 = vmul.f32 %v1418_v5, %v933_v4  ;;  %vm940_vm0 = vweird.f32 %v1418_v5 }
0x12ea   :  { %vm941_vm7 = vmor %vm939_vm4, %vm940_vm0 }
0x12eb   :  { %v936_v6 = vsub.f32 1.0, %v935_v9 }
0x12ed   :  { %v937_v10 = vmul.f32 %v1418_v5, %v936_v6 }
0x12ef   :  { %v938_v11 = vadd.f32 %v1418_v5, %v937_v10 }
0x12f1   :  { %v942_v13 = vsel %vm941_vm7, %v1418_v5, %v938_v11 }
0x12f2   :  { %v947_v16 = vsel %vm944_vm8, %v946_v14, %v942_v13 }
0x12f3   :  { %v950_v19 = vmul.f32 %v947_v16, %v1793_v7 }
0x1338   :  { %v953_v15 = vpop.permute.xlu2 %952 }
0x1339   :  { %v955_v17 = vmul.f32 %v953_v15, %v947_v16 }
0x133b   :  { %957 = vrot.lane.b32.xlu1 %v955_v17, %s1589_s3 }
0x1340   :  { %v663_v18 = vpop.permute.xlu2 %662 }
0x1341   :  { %v665_v26 = vmul.f32 %v663_v18, %v646_v54 }
0x1343   :  { %667 = vrot.lane.b32.xlu1 %v665_v26, %s1589_s3 }
0x13ad   :  { %v958_v27 = vpop.permute.xlu1 %957 }
0x13ae   :  { %v960_v28 = vadd.f32 %v958_v27, %v950_v19 }
0x13b0   :  { %1419 = vtanh.f32 %v960_v28 }
0x13b5   :  { %v668_v20 = vpop.permute.xlu1 %667 }
0x13b6   :  { %v1420_v21 = vpop.eup %1419  ;;  %670 = vst.msk [vmem:[#allocation2 + $0xe] sm:$0x3] %vm207_vm5, %v668_v20 }
0x13b7   :  { %963 = vrot.lane.b32.xlu0 %v1420_v21, %s1588_s15 }
0x13bd   :  { %v681_v29 = vld [vmem:[#allocation2 + $0x8] sm:$0xff] }
0x13be   :  { %1295 = vmatmul.msk.f32.gmra.mxu2 %vm141_vm6, %v681_v29 }
0x1429   :  { %v964_v22 = vpop.permute.xlu0 %963 }
0x142a   :  { %v966_v23 = vmul.f32 %v964_v22, %v947_v16 }
0x142c   :  { %969 = vrot.lane.b32.xlu2 %v966_v23, %s1589_s3 }
0x1441   :  { %v711_v24 = vpop.f32.mrf.mxu2 }
0x1442   :  { %v712_v25 = vadd.f32 %v1703_v0, %v711_v24 }
0x1444   :  { %715 = vst [vmem:[#allocation3 + $0x8] sm:$0xff] %v712_v25 }
0x144b   :  { %v967_v31 = vld [vmem:[#allocation3 + $0x8] sm:$0x3]  ;;  %v1031_v55 = vld [vmem:[#allocation3 + $0xa] sm:$0x3]  ;;  %v1095_v26 = vld [vmem:[#allocation3 + $0xc] sm:$0x3] }
0x1486   :  { %v970_v30 = vpop.permute.xlu2 %969 }
0x1487   :  { %1303 = vmatmul.msk.f32.vlgmr.msrb.gmra.mxu0 %vm141_vm6, %v970_v30 }
0x1504   :  { %v990_v32 = vpop.f32.mrf.mxu0 }
0x1505   :  { %v993_v33 = vadd.f32 %v990_v32, %v967_v31 }
0x1507   :  { %1421 = vtanh.f32 %v993_v33  ;;  %v1304_v35 = vmul.f32 -1.442695, %v993_v33 }
0x1509   :  { %1423 = vpow2.f32 %v1304_v35 }
0x150d   :  { %v1422_v34 = vpop.eup %1421 }
0x150e   :  { %1016 = vrot.lane.b32.xlu0 %v1422_v34, %s1588_s15 }
0x150f   :  { %v1424_v36 = vpop.eup %1423 }
0x1510   :  { %v997_v37 = vadd.f32 1.0, %v1424_v36 }
0x1512   :  { %1425 = vrcp.f32 %v997_v37  ;;  %v1009_v41 = vand.u32 2147483648, %v997_v37  ;;  %vm1003_vm9 = vweird.f32 %v997_v37  ;;  %v1007_v42 = vand.u32 2147483647, %v997_v37 }
0x1514   :  { %v1010_v44 = vor.u32 1.1754944e-38, %v1009_v41  ;;  %vm1008_vm11 = vcmp.eq.f32.partialorder %v1007_v42, 8.507059e+37 }
0x1518   :  { %v1426_v7 = vpop.eup %1425 }
0x1519   :  { %v999_v38 = vmul.f32 %v1426_v7, %v997_v37  ;;  %vm1004_vm5 = vweird.f32 %v1426_v7 }
0x151a   :  { %vm1005_vm10 = vmor %vm1003_vm9, %vm1004_vm5  ;;  %vm1256_vm9 = vcmask 33792  }
0x151b   :  { %v1000_v39 = vsub.f32 1.0, %v999_v38 }
0x151d   :  { %v1001_v0 = vmul.f32 %v1426_v7, %v1000_v39 }
0x151f   :  { %v1002_v40 = vadd.f32 %v1426_v7, %v1001_v0 }
0x1521   :  { %v1006_v43 = vsel %vm1005_vm10, %v1426_v7, %v1002_v40 }
0x1522   :  { %v1011_v46 = vsel %vm1008_vm11, %v1010_v44, %v1006_v43  ;;  %v1159_v43 = vld [vmem:[#allocation3 + $0xe] sm:$0x3] }
0x1523   :  { %v1014_v48 = vmul.f32 %v1011_v46, %v960_v28 }
0x1580   :  { %v1017_v45 = vpop.permute.xlu0 %1016 }
0x1581   :  { %v1019_v47 = vmul.f32 %v1017_v45, %v1011_v46 }
0x1583   :  { %1021 = vrot.lane.b32.xlu1 %v1019_v47, %s1589_s3 }
0x15f5   :  { %v1022_v49 = vpop.permute.xlu1 %1021 }
0x15f6   :  { %v1024_v50 = vadd.f32 %v1022_v49, %v1014_v48 }
0x15f8   :  { %1427 = vtanh.f32 %v1024_v50 }
0x15fe   :  { %v1428_v51 = vpop.eup %1427 }
0x15ff   :  { %1027 = vrot.lane.b32.xlu2 %v1428_v51, %s1588_s15 }
0x1659   :  { %v1028_v52 = vpop.permute.xlu2 %1027 }
0x165a   :  { %v1030_v53 = vmul.f32 %v1028_v52, %v1011_v46 }
0x165c   :  { %1033 = vrot.lane.b32.xlu0 %v1030_v53, %s1589_s3 }
0x16ce   :  { %v1034_v54 = vpop.permute.xlu0 %1033 }
0x16cf   :  { %1305 = vmatmul.msk.f32.vlgmr.msra.gmra.mxu1 %vm141_vm6, %v1034_v54 }
0x174c   :  { %v1054_v56 = vpop.f32.mrf.mxu1 }
0x174d   :  { %v1057_v57 = vadd.f32 %v1054_v56, %v1031_v55 }
0x174f   :  { %1429 = vtanh.f32 %v1057_v57  ;;  %v1306_v59 = vmul.f32 -1.442695, %v1057_v57 }
0x1751   :  { %1431 = vpow2.f32 %v1306_v59 }
0x1755   :  { %v1430_v58 = vpop.eup %1429 }
0x1756   :  { %1080 = vrot.lane.b32.xlu1 %v1430_v58, %s1588_s15 }
0x1757   :  { %v1432_v60 = vpop.eup %1431 }
0x1758   :  { %v1061_v61 = vadd.f32 1.0, %v1432_v60 }
0x175a   :  { %1433 = vrcp.f32 %v1061_v61  ;;  %v1073_v4 = vand.u32 2147483648, %v1061_v61  ;;  %vm1067_vm13 = vweird.f32 %v1061_v61  ;;  %v1071_v5 = vand.u32 2147483647, %v1061_v61 }
0x175c   :  { %v1074_v6 = vor.u32 1.1754944e-38, %v1073_v4  ;;  %vm1072_vm15 = vcmp.eq.f32.partialorder %v1071_v5, 8.507059e+37  ;;  %v1225_v4 = vld [vmem:[%s1857_s7 + $0x10] sm:$0xff]  ;;  %v1224_v5 = vld [vmem:[%s1857_s7 + $0x8] sm:$0xff] }
0x1760   :  { %v1434_v62 = vpop.eup %1433 }
0x1761   :  { %v1063_v1 = vmul.f32 %v1434_v62, %v1061_v61  ;;  %vm1068_vm12 = vweird.f32 %v1434_v62 }
0x1762   :  { %vm1069_vm14 = vmor %vm1067_vm13, %vm1068_vm12 }
0x1763   :  { %v1064_v8 = vsub.f32 1.0, %v1063_v1 }
0x1765   :  { %v1065_v2 = vmul.f32 %v1434_v62, %v1064_v8 }
0x1767   :  { %v1066_v3 = vadd.f32 %v1434_v62, %v1065_v2 }
0x1769   :  { %v1070_v9 = vsel %vm1069_vm14, %v1434_v62, %v1066_v3  ;;  %v1226_v3 = vld [vmem:[%s1857_s7 + $0x18] sm:$0xff] }
0x176a   :  { %v1075_v11 = vsel %vm1072_vm15, %v1074_v6, %v1070_v9  ;;  %1248 = vmatpush.msra.mxu0 %v1226_v3  ;;  %v1223_v9 = vld [vmem:[%s1857_s7] sm:$0xff] }
0x176b   :  { %v1078_v12 = vmul.f32 %v1075_v11, %v1024_v50 }
0x176c   :  { %1249 = vmatpush.msra.mxu0 %v1225_v4 }
0x176e   :  { %1250 = vmatpush.msra.mxu0 %v1224_v5 }
0x1770   :  { %1251 = vmatpush.msra.mxu0 %v1223_v9 }
0x17c8   :  { %v1081_v10 = vpop.permute.xlu1 %1080 }
0x17c9   :  { %v1083_v63 = vmul.f32 %v1081_v10, %v1075_v11 }
0x17cb   :  { %1085 = vrot.lane.b32.xlu2 %v1083_v63, %s1589_s3  ;;  %v1324_v63 = vld [vmem:[%s1858_s8] ss:$0 sm:$0xff] }
0x1825   :  { %v1086_v13 = vpop.permute.xlu2 %1085 }
0x1826   :  { %v1088_v14 = vadd.f32 %v1086_v13, %v1078_v12 }
0x1828   :  { %1435 = vtanh.f32 %v1088_v14 }
0x182e   :  { %v1436_v15 = vpop.eup %1435 }
0x182f   :  { %1091 = vrot.lane.b32.xlu0 %v1436_v15, %s1588_s15 }
0x18a1   :  { %v1092_v16 = vpop.permute.xlu0 %1091 }
0x18a2   :  { %v1094_v17 = vmul.f32 %v1092_v16, %v1075_v11 }
0x18a4   :  { %1097 = vrot.lane.b32.xlu1 %v1094_v17, %s1589_s3 }
0x1916   :  { %v1098_v18 = vpop.permute.xlu1 %1097 }
0x1917   :  { %1307 = vmatmul.msk.f32.vlgmr.msrb.gmra.mxu2 %vm141_vm6, %v1098_v18 }
0x199a   :  { %v1118_v19 = vpop.f32.mrf.mxu2 }
0x199b   :  { %v1121_v27 = vadd.f32 %v1118_v19, %v1095_v26 }
0x199d   :  { %1437 = vtanh.f32 %v1121_v27  ;;  %v1308_v20 = vmul.f32 -1.442695, %v1121_v27 }
0x199f   :  { %1439 = vpow2.f32 %v1308_v20 }
0x19a3   :  { %v1438_v28 = vpop.eup %1437 }
0x19a4   :  { %1144 = vrot.lane.b32.xlu2 %v1438_v28, %s1588_s15 }
0x19a5   :  { %v1440_v21 = vpop.eup %1439 }
0x19a6   :  { %v1125_v29 = vadd.f32 1.0, %v1440_v21 }
0x19a8   :  { %1441 = vrcp.f32 %v1125_v29  ;;  %v1137_v31 = vand.u32 2147483648, %v1125_v29  ;;  %vm1131_vm2 = vweird.f32 %v1125_v29  ;;  %v1135_v32 = vand.u32 2147483647, %v1125_v29 }
0x19aa   :  { %v1138_v34 = vor.u32 1.1754944e-38, %v1137_v31  ;;  %vm1136_vm0 = vcmp.eq.f32.partialorder %v1135_v32, 8.507059e+37 }
0x19ae   :  { %v1442_v22 = vpop.eup %1441 }
0x19af   :  { %v1127_v23 = vmul.f32 %v1442_v22, %v1125_v29  ;;  %vm1132_vm1 = vweird.f32 %v1442_v22 }
0x19b0   :  { %vm1133_vm3 = vmor %vm1131_vm2, %vm1132_vm1 }
0x19b1   :  { %v1128_v24 = vsub.f32 1.0, %v1127_v23 }
0x19b3   :  { %v1129_v25 = vmul.f32 %v1442_v22, %v1128_v24 }
0x19b5   :  { %v1130_v30 = vadd.f32 %v1442_v22, %v1129_v25 }
0x19b7   :  { %v1134_v33 = vsel %vm1133_vm3, %v1442_v22, %v1130_v30 }
0x19b8   :  { %v1139_v36 = vsel %vm1136_vm0, %v1138_v34, %v1134_v33 }
0x19b9   :  { %v1142_v7 = vmul.f32 %v1139_v36, %v1088_v14 }
0x19fe   :  { %v1145_v35 = vpop.permute.xlu2 %1144 }
0x19ff   :  { %v1147_v37 = vmul.f32 %v1145_v35, %v1139_v36 }
0x1a01   :  { %1149 = vrot.lane.b32.xlu0 %v1147_v37, %s1589_s3 }
0x1a73   :  { %v1150_v38 = vpop.permute.xlu0 %1149 }
0x1a74   :  { %v1152_v39 = vadd.f32 %v1150_v38, %v1142_v7 }
0x1a76   :  { %1443 = vtanh.f32 %v1152_v39 }
0x1a7c   :  { %v1444_v0 = vpop.eup %1443 }
0x1a7d   :  { %1155 = vrot.lane.b32.xlu1 %v1444_v0, %s1588_s15 }
0x1aef   :  { %v1156_v40 = vpop.permute.xlu1 %1155 }
0x1af0   :  { %v1158_v41 = vmul.f32 %v1156_v40, %v1139_v36 }
0x1af2   :  { %1161 = vrot.lane.b32.xlu2 %v1158_v41, %s1589_s3 }
0x1b4c   :  { %v1162_v42 = vpop.permute.xlu2 %1161 }
0x1b4d   :  { %1309 = vmatmul.msk.f32.vlgmr.msra.gmra.mxu3 %vm141_vm6, %v1162_v42 }
0x1bd0   :  { %v1182_v44 = vpop.f32.mrf.mxu3 }
0x1bd1   :  { %v1185_v45 = vadd.f32 %v1182_v44, %v1159_v43 }
0x1bd3   :  { %1445 = vtanh.f32 %v1185_v45  ;;  %v1310_v47 = vmul.f32 -1.442695, %v1185_v45 }
0x1bd5   :  { %1447 = vpow2.f32 %v1310_v47 }
0x1bd9   :  { %v1446_v46 = vpop.eup %1445 }
0x1bda   :  { %1208 = vrot.lane.b32.xlu0 %v1446_v46, %s1588_s15 }
0x1bdb   :  { %v1448_v48 = vpop.eup %1447 }
0x1bdc   :  { %v1189_v49 = vadd.f32 1.0, %v1448_v48 }
0x1bde   :  { %1449 = vrcp.f32 %v1189_v49  ;;  %v1201_v55 = vand.u32 2147483648, %v1189_v49  ;;  %vm1195_vm7 = vweird.f32 %v1189_v49  ;;  %v1199_v56 = vand.u32 2147483647, %v1189_v49 }
0x1be0   :  { %v1202_v58 = vor.u32 1.1754944e-38, %v1201_v55  ;;  %vm1200_vm5 = vcmp.eq.f32.partialorder %v1199_v56, 8.507059e+37 }
0x1be4   :  { %v1450_v50 = vpop.eup %1449 }
0x1be5   :  { %v1191_v51 = vmul.f32 %v1450_v50, %v1189_v49  ;;  %vm1196_vm4 = vweird.f32 %v1450_v50 }
0x1be6   :  { %vm1197_vm8 = vmor %vm1195_vm7, %vm1196_vm4 }
0x1be7   :  { %v1192_v52 = vsub.f32 1.0, %v1191_v51 }
0x1be9   :  { %v1193_v53 = vmul.f32 %v1450_v50, %v1192_v52 }
0x1beb   :  { %v1194_v54 = vadd.f32 %v1450_v50, %v1193_v53 }
0x1bed   :  { %v1198_v57 = vsel %vm1197_vm8, %v1450_v50, %v1194_v54 }
0x1bee   :  { %v1203_v60 = vsel %vm1200_vm5, %v1202_v58, %v1198_v57 }
0x1bef   :  { %v1206_v62 = vmul.f32 %v1203_v60, %v1152_v39 }
0x1c4c   :  { %v1209_v59 = vpop.permute.xlu0 %1208 }
0x1c4d   :  { %v1211_v61 = vmul.f32 %v1209_v59, %v1203_v60 }
0x1c4f   :  { %1213 = vrot.lane.b32.xlu1 %v1211_v61, %s1589_s3 }
0x1cc1   :  { %v1214_v1 = vpop.permute.xlu1 %1213 }
0x1cc2   :  { %v1216_v8 = vadd.f32 %v1214_v1, %v1206_v62 }
0x1cc4   :  { %1451 = vtanh.f32 %v1216_v8 }
0x1cca   :  { %v1452_v2 = vpop.eup %1451 }
0x1ccb   :  { %1219 = vrot.lane.b32.xlu2 %v1452_v2, %s1588_s15 }
0x1d25   :  { %v1220_v6 = vpop.permute.xlu2 %1219 }
0x1d26   :  { %v1222_v10 = vmul.f32 %v1220_v6, %v1203_v60 }
0x1d28   :  { %1232 = vrot.lane.b32.xlu0 %v1222_v10, %s1589_s3 }
0x1d9a   :  { %v1233_v11 = vpop.permute.xlu0 %1232 }
0x1d9b   :  { %1311 = vmatmul.msk.f32.vlgmr.msra.gmra.mxu0 %vm141_vm6, %v1233_v11 }
0x1e18   :  { %v1253_v12 = vpop.f32.mrf.mxu0 }
0x1e19   :  { %v1254_v13 = vadd.f32 %v1324_v63, %v1253_v12 }
0x1e1b   :  { %1257 = vst.msk [vmem:[#allocation12] sm:$0x3] %vm1256_vm9, %v1254_v13 }
0x1e1c   :  { %1268 = dma.vmem_to_hbm [thread:$0]  %s1264_s27, 32, %s1266_s4, [#allocation6]  }
0x1e1d   :  { %1579 = dma.done.wait [#allocation6], 32  }
0x1e1e   :  { %1580 = vsyncadd [#allocation6], 4294967264 }
0x1e1f   :  { %1273 = vsyncpa [#allocation5], 1 }
0x1e20   :  { %1274 = vsyncpa [#allocation8], 1 }
0x1e21   :  { %1275 = vsyncpa [#allocation11], 1 }
0x1e22   :  { %1276 = vsyncpa [#allocation6], 1 }

</bundles_post_ra>
